<compile_context>
chip_gen: v5e
topology: v5e:2x2
jax: 0.10.0
libtpu: 0.0.40
codegen_flags: <defaults>
</compile_context>

<pallas_src>
import jax
import jax.numpy as jnp
from jax.experimental import pallas as pl
from jax.experimental.pallas import tpu as pltpu


def _rnd(x, m):
    return -(-x // m) * m


def cnn_forward_pallas(x, p, *, pool_size, eps=1e-5, block_batch=32):
    B, C, L = x.shape
    C4, C2, C1 = p['w1'].shape[0], p['w2'].shape[0], p['w3'].shape[0]
    K1, K2, K3 = p['w1'].shape[2], p['w2'].shape[2], p['w3'].shape[2]
    p1, p2, p3 = K1 // 2, 1, 1

    # conv output lengths (PyTorch semantics, stride 1)
    L1 = L + 2 * p1 - K1 + 1
    L2 = L1 + 2 * p2 - K2 + 1
    L3 = L2 + 2 * p3 - K3 + 1
    P = L3 // pool_size
    F = C1 * P
    H1, OUT = p['wf1'].shape[0], p['wf2'].shape[0]
    assert p['wf1'].shape[1] == F, "fc1 input size must equal C * pooled length"

    # slot layout: each batch element owns S lanes; the layer-i activation starts at
    # in-slot offset o_i so every conv's zero padding is already in place.
    o0 = p1 + p2 + p3
    o1 = o0 - p1
    o2 = o1 - p2                                  # conv3 output starts at offset 0
    S = _rnd(max(o0 + L + p1, o1 + L1 + p2, o2 + L2 + p3, o0 + L, L3), 128)

    # batch blocking: keep NB >= 2 when B >= 2 so both v7x TensorCores get work.
    Bb = max(1, min(block_batch, -(-B // 2)))
    NB = -(-B // Bb)
    Bpad = NB * Bb
    BbS = Bb * S

    # lane widths per stage, rounded up to 128 (margins are zeroed by the lane masks
    # or ignored because wf1_big has zero rows for invalid positions).
    W3w = _rnd(BbS + pool_size - 1, 128)          # conv3 output width
    Wa2 = _rnd(W3w + K3 - 1, 128)                 # conv2 output width
    Wa1 = _rnd(Wa2 + K2 - 1, 128)                 # conv1 output width
    Wx = _rnd(Wa1 + K1 - 1, 128)                  # slotted-input width
    Cp = _rnd(C, 16)                              # input channels, bf16 sublane tile
    H1p = _rnd(H1, 128)                           # fc1 width, lane-dense
    OUTp = _rnd(OUT, 128)                         # lane-dense output, sliced back

    # ---- slotted input (NB, Cp, Wx) bf16: element b of a block occupies lanes
    #      [b*S + o0, b*S + o0 + L) of its grid-step slab ----
    xf = x.astype(jnp.float32)
    if Bpad > B:
        xf = jnp.concatenate([xf, jnp.zeros((Bpad - B, C, L), jnp.float32)], 0)
    if Cp > C:
        xf = jnp.concatenate([xf, jnp.zeros((Bpad, Cp - C, L), jnp.float32)], 1)
    xf = jnp.pad(xf, ((0, 0), (0, 0), (o0, S - o0 - L)))          # (Bpad, Cp, S)
    xf = xf.reshape(NB, Bb, Cp, S).transpose(0, 2, 1, 3).reshape(NB, Cp, BbS)
    x_slot = jnp.pad(xf, ((0, 0), (0, 0), (0, Wx - BbS))).astype(jnp.bfloat16)

    # ---- conv weights: BN scale folded in, per-tap layout (K, Cout, Cin), bf16 ----
    def fold(w, bias, gamma, beta, mean, var, cin_pad):
        s = gamma / jnp.sqrt(var + eps)
        shift = ((bias - mean) * s + beta)[:, None].astype(jnp.float32)
        wk = jnp.transpose(w, (2, 0, 1))                            # (K, Cout, Cin)
        if cin_pad > wk.shape[2]:
            wk = jnp.pad(wk, ((0, 0), (0, 0), (0, cin_pad - wk.shape[2])))
        wt = (wk * s[None, :, None]).astype(jnp.bfloat16)
        return wt, shift

    w1t, t1 = fold(p['w1'], p['b1'], p['g1'], p['be1'], p['m1'], p['v1'], Cp)
    w2t, t2 = fold(p['w2'], p['b2'], p['g2'], p['be2'], p['m2'], p['v2'], C4)
    w3t, t3 = fold(p['w3'], p['b3'], p['g3'], p['be3'], p['m3'], p['v3'], C2)

    # ---- 0/1 lane masks re-zeroing everything outside each element's valid region ----
    def lane_mask(width, off, ln):
        col = jnp.arange(width)
        ok = (col < BbS) & ((col % S) >= off) & ((col % S) < off + ln)
        return ok.astype(jnp.float32)[None, :]

    mask1 = lane_mask(Wa1, o1, L1)
    mask2 = lane_mask(Wa2, o2, L2)

    # ---- fc1 weight with MaxPool column selection + channel-major flatten folded in:
    #      row c*S + k equals wf1[:, c*P + j] when k == pool_size*j (j < P), else 0 ----
    wf1T = jnp.transpose(p['wf1']).reshape(C1, P, H1).astype(jnp.float32)
    wbig = jnp.zeros((C1, P, pool_size, H1), jnp.float32).at[:, :, 0, :].set(wf1T)
    wbig = wbig.reshape(C1, P * pool_size, H1)
    wbig = jnp.pad(wbig, ((0, 0), (0, S - P * pool_size), (0, 0)))
    wf1_big = jnp.pad(wbig.reshape(C1 * S, H1),
                      ((0, 0), (0, H1p - H1))).astype(jnp.bfloat16)
    bf1p = jnp.pad(p['bf1'], (0, H1p - H1))[None, :].astype(jnp.float32)
    wf2p = jnp.pad(jnp.transpose(p['wf2']),
                   ((0, H1p - H1), (0, OUTp - OUT))).astype(jnp.bfloat16)
    bf2p = jnp.pad(p['bf2'], (0, OUTp - OUT))[None, :].astype(jnp.float32)

    def kernel(x_ref, w1_ref, t1_ref, m1_ref, w2_ref, t2_ref, m2_ref,
               w3_ref, t3_ref, wf1_ref, bf1_ref, wf2_ref, bf2_ref,
               out_ref, flat_ref):
        xv = x_ref[0]                                               # (Cp, Wx) bf16

        # conv1 + BN1 + ReLU : K1 accumulating per-tap MXU matmuls (f32 accumulate)
        a1 = jnp.dot(w1_ref[0], xv[:, 0:Wa1], preferred_element_type=jnp.float32)
        for t in range(1, K1):
            a1 = a1 + jnp.dot(w1_ref[t], xv[:, t:t + Wa1],
                              preferred_element_type=jnp.float32)
        a1 = jnp.maximum(a1 + t1_ref[...], 0.0) * m1_ref[...]
        a1b = a1.astype(jnp.bfloat16)

        # conv2 + BN2 + ReLU
        a2 = jnp.dot(w2_ref[0], a1b[:, 0:Wa2], preferred_element_type=jnp.float32)
        for t in range(1, K2):
            a2 = a2 + jnp.dot(w2_ref[t], a1b[:, t:t + Wa2],
                              preferred_element_type=jnp.float32)
        a2 = jnp.maximum(a2 + t2_ref[...], 0.0) * m2_ref[...]
        a2b = a2.astype(jnp.bfloat16)

        # conv3 + BN3 + ReLU
        y3 = jnp.dot(w3_ref[0], a2b[:, 0:W3w], preferred_element_type=jnp.float32)
        for t in range(1, K3):
            y3 = y3 + jnp.dot(w3_ref[t], a2b[:, t:t + W3w],
                              preferred_element_type=jnp.float32)
        y3 = jnp.maximum(y3 + t3_ref[...], 0.0)

        # MaxPool1d: (pool-1) shifted maxes on the VPU; the pool-stride column
        # selection is folded into wf1_big, so no selection matmul is needed.
        zmax = y3[:, 0:BbS]
        for r in range(1, pool_size):
            zmax = jnp.maximum(zmax, y3[:, r:r + BbS])

        # lanes -> sublanes crossing: ONE dense, lane-aligned (1, C1*S) store per
        # element, assembled from aligned 128-lane slices (no masked stores).
        for b in range(Bb):
            flat_ref[b:b + 1, :] = jnp.concatenate(
                [zmax[c:c + 1, b * S:(b + 1) * S] for c in range(C1)], axis=1)

        # TODO(synk): nn.Dropout(0.5) is identity at inference; training-mode RNG
        # masking is not implemented.
        flat = flat_ref[...].astype(jnp.bfloat16)                   # (Bb, C1*S)
        h = jnp.dot(flat, wf1_ref[...], preferred_element_type=jnp.float32)
        h = jnp.maximum(h + bf1_ref[...], 0.0)
        out = jnp.dot(h.astype(jnp.bfloat16), wf2_ref[...],
                      preferred_element_type=jnp.float32) + bf2_ref[...]
        out_ref[0] = out

    inputs = [x_slot, w1t, t1, mask1, w2t, t2, mask2, w3t, t3,
              wf1_big, bf1p, wf2p, bf2p]

    # Replicated (constant block index) operands: the pipeline does not re-issue
    # their DMA on later grid steps because the block index never changes.
    def rep_spec(a):
        nd = a.ndim
        return pl.BlockSpec(a.shape, lambda i, nd=nd: (0,) * nd)

    in_specs = [pl.BlockSpec((1, Cp, Wx), lambda i: (i, 0, 0))]
    in_specs += [rep_spec(a) for a in inputs[1:]]

    grid_spec = pltpu.PrefetchScalarGridSpec(
        num_scalar_prefetch=0,
        grid=(NB,),
        in_specs=in_specs,
        out_specs=pl.BlockSpec((1, Bb, OUTp), lambda i: (i, 0, 0)),
        scratch_shapes=[pltpu.VMEM((Bb, C1 * S), jnp.float32)],
    )

    out = pl.pallas_call(
        kernel,
        out_shape=jax.ShapeDtypeStruct((NB, Bb, OUTp), jnp.float32),
        grid_spec=grid_spec,
        compiler_params=pltpu.CompilerParams(
            dimension_semantics=("parallel",),
            vmem_limit_bytes=32 * 1024 * 1024),
    )(*inputs)
    return out.reshape(NB * Bb, OUTp)[:B, :OUT]


def init_params(key, C, K1, OUT):
    """Deterministic synthetic parameters matching CNNModel.__init__ shapes."""
    C4, C2, C1 = 4 * C, 2 * C, C
    H_in = C * 49                 # hard-coded "num_channels * 49" in the torch module
    H1 = H_in // 2
    ks = jax.random.split(key, 24)

    def n(k, shape, scale=0.1):
        return scale * jax.random.normal(k, shape, jnp.float32)

    p = dict(
        w1=n(ks[0], (C4, C, K1)), b1=n(ks[1], (C4,)),
        g1=1.0 + n(ks[2], (C4,)), be1=n(ks[3], (C4,)),
        m1=n(ks[4], (C4,)), v1=1.0 + 0.1 * jnp.abs(jax.random.normal(ks[5], (C4,))),
        w2=n(ks[6], (C2, C4, 3)), b2=n(ks[7], (C2,)),
        g2=1.0 + n(ks[8], (C2,)), be2=n(ks[9], (C2,)),
        m2=n(ks[10], (C2,)), v2=1.0 + 0.1 * jnp.abs(jax.random.normal(ks[11], (C2,))),
        w3=n(ks[12], (C1, C2, 5)), b3=n(ks[13], (C1,)),
        g3=1.0 + n(ks[14], (C1,)), be3=n(ks[15], (C1,)),
        m3=n(ks[16], (C1,)), v3=1.0 + 0.1 * jnp.abs(jax.random.normal(ks[17], (C1,))),
        wf1=n(ks[18], (H1, H_in)), bf1=n(ks[19], (H1,)),
        wf2=n(ks[20], (OUT, H1)), bf2=n(ks[21], (OUT,)),
    )
    return p


def cnn_forward_ref(x, p, *, pool_size, eps=1e-5):
    """Pure-JAX (f32) reference mirroring the PyTorch forward (inference mode)."""
    def conv1d(x, w, b, pad):
        y = jax.lax.conv_general_dilated(
            x, w, window_strides=(1,), padding=[(pad, pad)],
            dimension_numbers=('NCH', 'OIH', 'NCH'))
        return y + b[None, :, None]

    def bn(y, g, be, m, v):
        return ((y - m[None, :, None]) / jnp.sqrt(v[None, :, None] + eps)
                * g[None, :, None] + be[None, :, None])

    relu = lambda z: jnp.maximum(z, 0.0)
    K1 = p['w1'].shape[2]
    y = relu(bn(conv1d(x, p['w1'], p['b1'], K1 // 2), p['g1'], p['be1'], p['m1'], p['v1']))
    y = relu(bn(conv1d(y, p['w2'], p['b2'], 1), p['g2'], p['be2'], p['m2'], p['v2']))
    y = relu(bn(conv1d(y, p['w3'], p['b3'], 1), p['g3'], p['be3'], p['m3'], p['v3']))
    B, Cc, L3 = y.shape
    P = L3 // pool_size
    y = y[:, :, :P * pool_size].reshape(B, Cc, P, pool_size).max(axis=-1)
    flat = y.reshape(B, -1)
    h = relu(flat @ p['wf1'].T + p['bf1'][None, :])
    return h @ p['wf2'].T + p['bf2'][None, :]


if __name__ == "__main__":
    # num_channels=4, kernel_size=5, pool_size=2, output_shape=2; sequence length 100
    # so the pooled length is exactly 49 (fc1 expects num_channels*49 inputs).
    B, C, L = 2, 4, 100
    K1, pool_size, OUT = 5, 2, 2

    key = jax.random.PRNGKey(0)
    kx, kp = jax.random.split(key)
    x = jax.random.normal(kx, (B, C, L), jnp.float32)

    P = (L - 2) // pool_size
    assert P == 49, "sequence length must make the pooled length 49 (fc1 expects C*49)"

    params = init_params(kp, C, K1, OUT)

    out = jax.block_until_ready(cnn_forward_pallas(x, params, pool_size=pool_size))
    ref = cnn_forward_ref(x, params, pool_size=pool_size)
    assert out.shape == (B, OUT)
    # bf16 MXU operands with f32 accumulation (per perf review) -> relaxed tolerance
    # vs. the f32 reference.
    assert jnp.allclose(out, ref, rtol=3e-2, atol=3e-2), (out, ref)

    # also exercise the multi-block batching + batch-padding path (Bb=2, NB=3)
    B2 = 5
    x2 = jax.random.normal(jax.random.PRNGKey(1), (B2, C, L), jnp.float32)
    out2 = jax.block_until_ready(
        cnn_forward_pallas(x2, params, pool_size=pool_size, block_batch=2))
    ref2 = cnn_forward_ref(x2, params, pool_size=pool_size)
    assert out2.shape == (B2, OUT)
    assert jnp.allclose(out2, ref2, rtol=3e-2, atol=3e-2), (out2, ref2)

    print("KERNEL_OK")
</pallas_src>

<mosaic_0001>
module attributes {stable_mosaic.version = 11 : i64} {
  func.func @kernel(%arg0: i32, %arg1: memref<1x16x640xbf16, #tpu.memory_space<vmem>>, %arg2: memref<5x16x16xbf16, #tpu.memory_space<vmem>>, %arg3: memref<16x1xf32, #tpu.memory_space<vmem>>, %arg4: memref<1x512xf32, #tpu.memory_space<vmem>>, %arg5: memref<3x8x16xbf16, #tpu.memory_space<vmem>>, %arg6: memref<8x1xf32, #tpu.memory_space<vmem>>, %arg7: memref<1x384xf32, #tpu.memory_space<vmem>>, %arg8: memref<5x4x8xbf16, #tpu.memory_space<vmem>>, %arg9: memref<4x1xf32, #tpu.memory_space<vmem>>, %arg10: memref<512x128xbf16, #tpu.memory_space<vmem>>, %arg11: memref<1x128xf32, #tpu.memory_space<vmem>>, %arg12: memref<128x128xbf16, #tpu.memory_space<vmem>>, %arg13: memref<1x128xf32, #tpu.memory_space<vmem>>, %arg14: memref<1x1x128xf32, #tpu.memory_space<vmem>>, %arg15: memref<1x512xf32, #tpu.memory_space<vmem>>) attributes {dimension_semantics = [#tpu.dimension_semantics<parallel>], iteration_bounds = array<i64: 2>, scalar_prefetch = 0 : i64, scratch_operands = 1 : i64, tpu.core_type = #tpu.core_type<tc>, window_params = [{transform_indices = @transform_0, window_bounds = array<i64: 1, 16, 640>}, {pipeline_mode = #tpu.pipeline_mode<synchronous>, transform_indices = @transform_1, window_bounds = array<i64: 5, 16, 16>}, {pipeline_mode = #tpu.pipeline_mode<synchronous>, transform_indices = @transform_2, window_bounds = array<i64: 16, 1>}, {pipeline_mode = #tpu.pipeline_mode<synchronous>, transform_indices = @transform_3, window_bounds = array<i64: 1, 512>}, {pipeline_mode = #tpu.pipeline_mode<synchronous>, transform_indices = @transform_4, window_bounds = array<i64: 3, 8, 16>}, {pipeline_mode = #tpu.pipeline_mode<synchronous>, transform_indices = @transform_5, window_bounds = array<i64: 8, 1>}, {pipeline_mode = #tpu.pipeline_mode<synchronous>, transform_indices = @transform_6, window_bounds = array<i64: 1, 384>}, {pipeline_mode = #tpu.pipeline_mode<synchronous>, transform_indices = @transform_7, window_bounds = array<i64: 5, 4, 8>}, {pipeline_mode = #tpu.pipeline_mode<synchronous>, transform_indices = @transform_8, window_bounds = array<i64: 4, 1>}, {pipeline_mode = #tpu.pipeline_mode<synchronous>, transform_indices = @transform_9, window_bounds = array<i64: 512, 128>}, {pipeline_mode = #tpu.pipeline_mode<synchronous>, transform_indices = @transform_10, window_bounds = array<i64: 1, 128>}, {pipeline_mode = #tpu.pipeline_mode<synchronous>, transform_indices = @transform_11, window_bounds = array<i64: 128, 128>}, {pipeline_mode = #tpu.pipeline_mode<synchronous>, transform_indices = @transform_12, window_bounds = array<i64: 1, 128>}, {transform_indices = @transform_13, window_bounds = array<i64: 1, 1, 128>}]} {
    %c0 = arith.constant 0 : index
    %c0_0 = arith.constant 0 : index
    %c0_1 = arith.constant 0 : index
    %0 = vector.load %arg1[%c0, %c0_0, %c0_1] : memref<1x16x640xbf16, #tpu.memory_space<vmem>>, vector<1x16x640xbf16>
    %1 = vector.shape_cast %0 : vector<1x16x640xbf16> to vector<16x640xbf16>
    %c0_2 = arith.constant 0 : index
    %c0_3 = arith.constant 0 : index
    %c0_4 = arith.constant 0 : index
    %2 = vector.load %arg2[%c0_2, %c0_3, %c0_4] : memref<5x16x16xbf16, #tpu.memory_space<vmem>>, vector<1x16x16xbf16>
    %3 = vector.shape_cast %2 : vector<1x16x16xbf16> to vector<16x16xbf16>
    %4 = vector.extract_strided_slice %1 {offsets = [0, 0], sizes = [16, 512], strides = [1, 1]} : vector<16x640xbf16> to vector<16x512xbf16>
    %cst = arith.constant dense<0.000000e+00> : vector<16x512xf32>
    %5 = tpu.matmul %3, %4, %cst {dimension_numbers = #tpu.dot_dimension_numbers<[1], [0], [0], [1], [0, 0, 1, 1], [], []>} : vector<16x16xbf16>, vector<16x512xbf16>, vector<16x512xf32> -> vector<16x512xf32>
    %c1 = arith.constant 1 : index
    %c0_5 = arith.constant 0 : index
    %c0_6 = arith.constant 0 : index
    %6 = vector.load %arg2[%c1, %c0_5, %c0_6] : memref<5x16x16xbf16, #tpu.memory_space<vmem>>, vector<1x16x16xbf16>
    %7 = vector.shape_cast %6 : vector<1x16x16xbf16> to vector<16x16xbf16>
    %8 = vector.extract_strided_slice %1 {offsets = [0, 1], sizes = [16, 512], strides = [1, 1]} : vector<16x640xbf16> to vector<16x512xbf16>
    %cst_7 = arith.constant dense<0.000000e+00> : vector<16x512xf32>
    %9 = tpu.matmul %7, %8, %cst_7 {dimension_numbers = #tpu.dot_dimension_numbers<[1], [0], [0], [1], [0, 0, 1, 1], [], []>} : vector<16x16xbf16>, vector<16x512xbf16>, vector<16x512xf32> -> vector<16x512xf32>
    %10 = arith.addf %5, %9 : vector<16x512xf32>
    %c2 = arith.constant 2 : index
    %c0_8 = arith.constant 0 : index
    %c0_9 = arith.constant 0 : index
    %11 = vector.load %arg2[%c2, %c0_8, %c0_9] : memref<5x16x16xbf16, #tpu.memory_space<vmem>>, vector<1x16x16xbf16>
    %12 = vector.shape_cast %11 : vector<1x16x16xbf16> to vector<16x16xbf16>
    %13 = vector.extract_strided_slice %1 {offsets = [0, 2], sizes = [16, 512], strides = [1, 1]} : vector<16x640xbf16> to vector<16x512xbf16>
    %cst_10 = arith.constant dense<0.000000e+00> : vector<16x512xf32>
    %14 = tpu.matmul %12, %13, %cst_10 {dimension_numbers = #tpu.dot_dimension_numbers<[1], [0], [0], [1], [0, 0, 1, 1], [], []>} : vector<16x16xbf16>, vector<16x512xbf16>, vector<16x512xf32> -> vector<16x512xf32>
    %15 = arith.addf %10, %14 : vector<16x512xf32>
    %c3 = arith.constant 3 : index
    %c0_11 = arith.constant 0 : index
    %c0_12 = arith.constant 0 : index
    %16 = vector.load %arg2[%c3, %c0_11, %c0_12] : memref<5x16x16xbf16, #tpu.memory_space<vmem>>, vector<1x16x16xbf16>
    %17 = vector.shape_cast %16 : vector<1x16x16xbf16> to vector<16x16xbf16>
    %18 = vector.extract_strided_slice %1 {offsets = [0, 3], sizes = [16, 512], strides = [1, 1]} : vector<16x640xbf16> to vector<16x512xbf16>
    %cst_13 = arith.constant dense<0.000000e+00> : vector<16x512xf32>
    %19 = tpu.matmul %17, %18, %cst_13 {dimension_numbers = #tpu.dot_dimension_numbers<[1], [0], [0], [1], [0, 0, 1, 1], [], []>} : vector<16x16xbf16>, vector<16x512xbf16>, vector<16x512xf32> -> vector<16x512xf32>
    %20 = arith.addf %15, %19 : vector<16x512xf32>
    %c4 = arith.constant 4 : index
    %c0_14 = arith.constant 0 : index
    %c0_15 = arith.constant 0 : index
    %21 = vector.load %arg2[%c4, %c0_14, %c0_15] : memref<5x16x16xbf16, #tpu.memory_space<vmem>>, vector<1x16x16xbf16>
    %22 = vector.shape_cast %21 : vector<1x16x16xbf16> to vector<16x16xbf16>
    %23 = vector.extract_strided_slice %1 {offsets = [0, 4], sizes = [16, 512], strides = [1, 1]} : vector<16x640xbf16> to vector<16x512xbf16>
    %cst_16 = arith.constant dense<0.000000e+00> : vector<16x512xf32>
    %24 = tpu.matmul %22, %23, %cst_16 {dimension_numbers = #tpu.dot_dimension_numbers<[1], [0], [0], [1], [0, 0, 1, 1], [], []>} : vector<16x16xbf16>, vector<16x512xbf16>, vector<16x512xf32> -> vector<16x512xf32>
    %25 = arith.addf %20, %24 : vector<16x512xf32>
    %c0_17 = arith.constant 0 : index
    %c0_18 = arith.constant 0 : index
    %26 = vector.load %arg3[%c0_17, %c0_18] : memref<16x1xf32, #tpu.memory_space<vmem>>, vector<16x1xf32>
    %27 = vector.broadcast %26 : vector<16x1xf32> to vector<16x512xf32>
    %28 = arith.addf %25, %27 : vector<16x512xf32>
    %cst_19 = arith.constant 0.000000e+00 : f32
    %29 = vector.broadcast %cst_19 : f32 to vector<16x512xf32>
    %30 = arith.maximumf %28, %29 : vector<16x512xf32>
    %c0_20 = arith.constant 0 : index
    %c0_21 = arith.constant 0 : index
    %31 = vector.load %arg4[%c0_20, %c0_21] : memref<1x512xf32, #tpu.memory_space<vmem>>, vector<1x512xf32>
    %32 = vector.broadcast %31 : vector<1x512xf32> to vector<16x512xf32>
    %33 = arith.mulf %30, %32 : vector<16x512xf32>
    %34 = arith.truncf %33 : vector<16x512xf32> to vector<16x512xbf16>
    %c0_22 = arith.constant 0 : index
    %c0_23 = arith.constant 0 : index
    %c0_24 = arith.constant 0 : index
    %35 = vector.load %arg5[%c0_22, %c0_23, %c0_24] : memref<3x8x16xbf16, #tpu.memory_space<vmem>>, vector<1x8x16xbf16>
    %36 = vector.shape_cast %35 : vector<1x8x16xbf16> to vector<8x16xbf16>
    %37 = vector.extract_strided_slice %34 {offsets = [0, 0], sizes = [16, 384], strides = [1, 1]} : vector<16x512xbf16> to vector<16x384xbf16>
    %cst_25 = arith.constant dense<0.000000e+00> : vector<8x384xf32>
    %38 = tpu.matmul %36, %37, %cst_25 {dimension_numbers = #tpu.dot_dimension_numbers<[1], [0], [0], [1], [0, 0, 1, 1], [], []>} : vector<8x16xbf16>, vector<16x384xbf16>, vector<8x384xf32> -> vector<8x384xf32>
    %c1_26 = arith.constant 1 : index
    %c0_27 = arith.constant 0 : index
    %c0_28 = arith.constant 0 : index
    %39 = vector.load %arg5[%c1_26, %c0_27, %c0_28] : memref<3x8x16xbf16, #tpu.memory_space<vmem>>, vector<1x8x16xbf16>
    %40 = vector.shape_cast %39 : vector<1x8x16xbf16> to vector<8x16xbf16>
    %41 = vector.extract_strided_slice %34 {offsets = [0, 1], sizes = [16, 384], strides = [1, 1]} : vector<16x512xbf16> to vector<16x384xbf16>
    %cst_29 = arith.constant dense<0.000000e+00> : vector<8x384xf32>
    %42 = tpu.matmul %40, %41, %cst_29 {dimension_numbers = #tpu.dot_dimension_numbers<[1], [0], [0], [1], [0, 0, 1, 1], [], []>} : vector<8x16xbf16>, vector<16x384xbf16>, vector<8x384xf32> -> vector<8x384xf32>
    %43 = arith.addf %38, %42 : vector<8x384xf32>
    %c2_30 = arith.constant 2 : index
    %c0_31 = arith.constant 0 : index
    %c0_32 = arith.constant 0 : index
    %44 = vector.load %arg5[%c2_30, %c0_31, %c0_32] : memref<3x8x16xbf16, #tpu.memory_space<vmem>>, vector<1x8x16xbf16>
    %45 = vector.shape_cast %44 : vector<1x8x16xbf16> to vector<8x16xbf16>
    %46 = vector.extract_strided_slice %34 {offsets = [0, 2], sizes = [16, 384], strides = [1, 1]} : vector<16x512xbf16> to vector<16x384xbf16>
    %cst_33 = arith.constant dense<0.000000e+00> : vector<8x384xf32>
    %47 = tpu.matmul %45, %46, %cst_33 {dimension_numbers = #tpu.dot_dimension_numbers<[1], [0], [0], [1], [0, 0, 1, 1], [], []>} : vector<8x16xbf16>, vector<16x384xbf16>, vector<8x384xf32> -> vector<8x384xf32>
    %48 = arith.addf %43, %47 : vector<8x384xf32>
    %c0_34 = arith.constant 0 : index
    %c0_35 = arith.constant 0 : index
    %49 = vector.load %arg6[%c0_34, %c0_35] : memref<8x1xf32, #tpu.memory_space<vmem>>, vector<8x1xf32>
    %50 = vector.broadcast %49 : vector<8x1xf32> to vector<8x384xf32>
    %51 = arith.addf %48, %50 : vector<8x384xf32>
    %cst_36 = arith.constant 0.000000e+00 : f32
    %52 = vector.broadcast %cst_36 : f32 to vector<8x384xf32>
    %53 = arith.maximumf %51, %52 : vector<8x384xf32>
    %c0_37 = arith.constant 0 : index
    %c0_38 = arith.constant 0 : index
    %54 = vector.load %arg7[%c0_37, %c0_38] : memref<1x384xf32, #tpu.memory_space<vmem>>, vector<1x384xf32>
    %55 = vector.broadcast %54 : vector<1x384xf32> to vector<8x384xf32>
    %56 = arith.mulf %53, %55 : vector<8x384xf32>
    %57 = arith.truncf %56 : vector<8x384xf32> to vector<8x384xbf16>
    %c0_39 = arith.constant 0 : index
    %c0_40 = arith.constant 0 : index
    %c0_41 = arith.constant 0 : index
    %58 = vector.load %arg8[%c0_39, %c0_40, %c0_41] : memref<5x4x8xbf16, #tpu.memory_space<vmem>>, vector<1x4x8xbf16>
    %59 = vector.shape_cast %58 : vector<1x4x8xbf16> to vector<4x8xbf16>
    %60 = vector.extract_strided_slice %57 {offsets = [0, 0], sizes = [8, 256], strides = [1, 1]} : vector<8x384xbf16> to vector<8x256xbf16>
    %cst_42 = arith.constant dense<0.000000e+00> : vector<4x256xf32>
    %61 = tpu.matmul %59, %60, %cst_42 {dimension_numbers = #tpu.dot_dimension_numbers<[1], [0], [0], [1], [0, 0, 1, 1], [], []>} : vector<4x8xbf16>, vector<8x256xbf16>, vector<4x256xf32> -> vector<4x256xf32>
    %c1_43 = arith.constant 1 : index
    %c0_44 = arith.constant 0 : index
    %c0_45 = arith.constant 0 : index
    %62 = vector.load %arg8[%c1_43, %c0_44, %c0_45] : memref<5x4x8xbf16, #tpu.memory_space<vmem>>, vector<1x4x8xbf16>
    %63 = vector.shape_cast %62 : vector<1x4x8xbf16> to vector<4x8xbf16>
    %64 = vector.extract_strided_slice %57 {offsets = [0, 1], sizes = [8, 256], strides = [1, 1]} : vector<8x384xbf16> to vector<8x256xbf16>
    %cst_46 = arith.constant dense<0.000000e+00> : vector<4x256xf32>
    %65 = tpu.matmul %63, %64, %cst_46 {dimension_numbers = #tpu.dot_dimension_numbers<[1], [0], [0], [1], [0, 0, 1, 1], [], []>} : vector<4x8xbf16>, vector<8x256xbf16>, vector<4x256xf32> -> vector<4x256xf32>
    %66 = arith.addf %61, %65 : vector<4x256xf32>
    %c2_47 = arith.constant 2 : index
    %c0_48 = arith.constant 0 : index
    %c0_49 = arith.constant 0 : index
    %67 = vector.load %arg8[%c2_47, %c0_48, %c0_49] : memref<5x4x8xbf16, #tpu.memory_space<vmem>>, vector<1x4x8xbf16>
    %68 = vector.shape_cast %67 : vector<1x4x8xbf16> to vector<4x8xbf16>
    %69 = vector.extract_strided_slice %57 {offsets = [0, 2], sizes = [8, 256], strides = [1, 1]} : vector<8x384xbf16> to vector<8x256xbf16>
    %cst_50 = arith.constant dense<0.000000e+00> : vector<4x256xf32>
    %70 = tpu.matmul %68, %69, %cst_50 {dimension_numbers = #tpu.dot_dimension_numbers<[1], [0], [0], [1], [0, 0, 1, 1], [], []>} : vector<4x8xbf16>, vector<8x256xbf16>, vector<4x256xf32> -> vector<4x256xf32>
    %71 = arith.addf %66, %70 : vector<4x256xf32>
    %c3_51 = arith.constant 3 : index
    %c0_52 = arith.constant 0 : index
    %c0_53 = arith.constant 0 : index
    %72 = vector.load %arg8[%c3_51, %c0_52, %c0_53] : memref<5x4x8xbf16, #tpu.memory_space<vmem>>, vector<1x4x8xbf16>
    %73 = vector.shape_cast %72 : vector<1x4x8xbf16> to vector<4x8xbf16>
    %74 = vector.extract_strided_slice %57 {offsets = [0, 3], sizes = [8, 256], strides = [1, 1]} : vector<8x384xbf16> to vector<8x256xbf16>
    %cst_54 = arith.constant dense<0.000000e+00> : vector<4x256xf32>
    %75 = tpu.matmul %73, %74, %cst_54 {dimension_numbers = #tpu.dot_dimension_numbers<[1], [0], [0], [1], [0, 0, 1, 1], [], []>} : vector<4x8xbf16>, vector<8x256xbf16>, vector<4x256xf32> -> vector<4x256xf32>
    %76 = arith.addf %71, %75 : vector<4x256xf32>
    %c4_55 = arith.constant 4 : index
    %c0_56 = arith.constant 0 : index
    %c0_57 = arith.constant 0 : index
    %77 = vector.load %arg8[%c4_55, %c0_56, %c0_57] : memref<5x4x8xbf16, #tpu.memory_space<vmem>>, vector<1x4x8xbf16>
    %78 = vector.shape_cast %77 : vector<1x4x8xbf16> to vector<4x8xbf16>
    %79 = vector.extract_strided_slice %57 {offsets = [0, 4], sizes = [8, 256], strides = [1, 1]} : vector<8x384xbf16> to vector<8x256xbf16>
    %cst_58 = arith.constant dense<0.000000e+00> : vector<4x256xf32>
    %80 = tpu.matmul %78, %79, %cst_58 {dimension_numbers = #tpu.dot_dimension_numbers<[1], [0], [0], [1], [0, 0, 1, 1], [], []>} : vector<4x8xbf16>, vector<8x256xbf16>, vector<4x256xf32> -> vector<4x256xf32>
    %81 = arith.addf %76, %80 : vector<4x256xf32>
    %c0_59 = arith.constant 0 : index
    %c0_60 = arith.constant 0 : index
    %82 = vector.load %arg9[%c0_59, %c0_60] : memref<4x1xf32, #tpu.memory_space<vmem>>, vector<4x1xf32>
    %83 = vector.broadcast %82 : vector<4x1xf32> to vector<4x256xf32>
    %84 = arith.addf %81, %83 : vector<4x256xf32>
    %cst_61 = arith.constant 0.000000e+00 : f32
    %85 = vector.broadcast %cst_61 : f32 to vector<4x256xf32>
    %86 = arith.maximumf %84, %85 : vector<4x256xf32>
    %87 = vector.extract_strided_slice %86 {offsets = [0, 0], sizes = [4, 128], strides = [1, 1]} : vector<4x256xf32> to vector<4x128xf32>
    %88 = vector.extract_strided_slice %86 {offsets = [0, 1], sizes = [4, 128], strides = [1, 1]} : vector<4x256xf32> to vector<4x128xf32>
    %89 = arith.maximumf %87, %88 : vector<4x128xf32>
    %90 = vector.extract_strided_slice %89 {offsets = [0, 0], sizes = [1, 128], strides = [1, 1]} : vector<4x128xf32> to vector<1x128xf32>
    %91 = vector.extract_strided_slice %89 {offsets = [1, 0], sizes = [1, 128], strides = [1, 1]} : vector<4x128xf32> to vector<1x128xf32>
    %92 = vector.extract_strided_slice %89 {offsets = [2, 0], sizes = [1, 128], strides = [1, 1]} : vector<4x128xf32> to vector<1x128xf32>
    %93 = vector.extract_strided_slice %89 {offsets = [3, 0], sizes = [1, 128], strides = [1, 1]} : vector<4x128xf32> to vector<1x128xf32>
    %94 = tpu.concatenate %90, %91, %92, %93 in 1 : vector<1x128xf32>, vector<1x128xf32>, vector<1x128xf32>, vector<1x128xf32> -> vector<1x512xf32>
    %c0_62 = arith.constant 0 : index
    %c0_63 = arith.constant 0 : index
    %95 = vector.load %arg15[%c0_62, %c0_63] : memref<1x512xf32, #tpu.memory_space<vmem>>, vector<1x512xf32>
    tpu.vector_store %arg15[%c0_62, %c0_63], %94 {strides = array<i32>} : memref<1x512xf32, #tpu.memory_space<vmem>>, vector<1x512xf32>,
    %c0_64 = arith.constant 0 : index
    %c0_65 = arith.constant 0 : index
    %96 = vector.load %arg15[%c0_64, %c0_65] : memref<1x512xf32, #tpu.memory_space<vmem>>, vector<1x512xf32>
    %97 = arith.truncf %96 : vector<1x512xf32> to vector<1x512xbf16>
    %c0_66 = arith.constant 0 : index
    %c0_67 = arith.constant 0 : index
    %98 = vector.load %arg10[%c0_66, %c0_67] : memref<512x128xbf16, #tpu.memory_space<vmem>>, vector<512x128xbf16>
    %cst_68 = arith.constant dense<0.000000e+00> : vector<1x128xf32>
    %99 = tpu.matmul %97, %98, %cst_68 {dimension_numbers = #tpu.dot_dimension_numbers<[1], [0], [0], [1], [0, 0, 1, 1], [], []>} : vector<1x512xbf16>, vector<512x128xbf16>, vector<1x128xf32> -> vector<1x128xf32>
    %c0_69 = arith.constant 0 : index
    %c0_70 = arith.constant 0 : index
    %100 = vector.load %arg11[%c0_69, %c0_70] : memref<1x128xf32, #tpu.memory_space<vmem>>, vector<1x128xf32>
    %101 = arith.addf %99, %100 : vector<1x128xf32>
    %cst_71 = arith.constant 0.000000e+00 : f32
    %102 = vector.broadcast %cst_71 : f32 to vector<1x128xf32>
    %103 = arith.maximumf %101, %102 : vector<1x128xf32>
    %104 = arith.truncf %103 : vector<1x128xf32> to vector<1x128xbf16>
    %c0_72 = arith.constant 0 : index
    %c0_73 = arith.constant 0 : index
    %105 = vector.load %arg12[%c0_72, %c0_73] : memref<128x128xbf16, #tpu.memory_space<vmem>>, vector<128x128xbf16>
    %cst_74 = arith.constant dense<0.000000e+00> : vector<1x128xf32>
    %106 = tpu.matmul %104, %105, %cst_74 {dimension_numbers = #tpu.dot_dimension_numbers<[1], [0], [0], [1], [0, 0, 1, 1], [], []>} : vector<1x128xbf16>, vector<128x128xbf16>, vector<1x128xf32> -> vector<1x128xf32>
    %c0_75 = arith.constant 0 : index
    %c0_76 = arith.constant 0 : index
    %107 = vector.load %arg13[%c0_75, %c0_76] : memref<1x128xf32, #tpu.memory_space<vmem>>, vector<1x128xf32>
    %108 = arith.addf %106, %107 : vector<1x128xf32>
    %c0_77 = arith.constant 0 : index
    %c0_78 = arith.constant 0 : index
    %c0_79 = arith.constant 0 : index
    %109 = vector.load %arg14[%c0_77, %c0_78, %c0_79] : memref<1x1x128xf32, #tpu.memory_space<vmem>>, vector<1x1x128xf32>
    %110 = vector.shape_cast %109 : vector<1x1x128xf32> to vector<1x128xf32>
    %111 = vector.shape_cast %108 : vector<1x128xf32> to vector<1x1x128xf32>
    tpu.vector_store %arg14[%c0_77, %c0_78, %c0_79], %111 {strides = array<i32>} : memref<1x1x128xf32, #tpu.memory_space<vmem>>, vector<1x1x128xf32>,
    return
  }
  func.func @transform_0(%arg0: i32) -> (i32, i32, i32) {
    %c0_i32 = arith.constant 0 : i32
    %c0_i32_0 = arith.constant 0 : i32
    %c0_i32_1 = arith.constant 0 : i32
    return %arg0, %c0_i32, %c0_i32_0 : i32, i32, i32
  }
  func.func @transform_1(%arg0: i32) -> (i32, i32, i32) {
    %c0_i32 = arith.constant 0 : i32
    %c0_i32_0 = arith.constant 0 : i32
    %c0_i32_1 = arith.constant 0 : i32
    %c0_i32_2 = arith.constant 0 : i32
    return %c0_i32, %c0_i32_0, %c0_i32_1 : i32, i32, i32
  }
  func.func @transform_2(%arg0: i32) -> (i32, i32) {
    %c0_i32 = arith.constant 0 : i32
    %c0_i32_0 = arith.constant 0 : i32
    %c0_i32_1 = arith.constant 0 : i32
    return %c0_i32, %c0_i32_0 : i32, i32
  }
  func.func @transform_3(%arg0: i32) -> (i32, i32) {
    %c0_i32 = arith.constant 0 : i32
    %c0_i32_0 = arith.constant 0 : i32
    %c0_i32_1 = arith.constant 0 : i32
    return %c0_i32, %c0_i32_0 : i32, i32
  }
  func.func @transform_4(%arg0: i32) -> (i32, i32, i32) {
    %c0_i32 = arith.constant 0 : i32
    %c0_i32_0 = arith.constant 0 : i32
    %c0_i32_1 = arith.constant 0 : i32
    %c0_i32_2 = arith.constant 0 : i32
    return %c0_i32, %c0_i32_0, %c0_i32_1 : i32, i32, i32
  }
  func.func @transform_5(%arg0: i32) -> (i32, i32) {
    %c0_i32 = arith.constant 0 : i32
    %c0_i32_0 = arith.constant 0 : i32
    %c0_i32_1 = arith.constant 0 : i32
    return %c0_i32, %c0_i32_0 : i32, i32
  }
  func.func @transform_6(%arg0: i32) -> (i32, i32) {
    %c0_i32 = arith.constant 0 : i32
    %c0_i32_0 = arith.constant 0 : i32
    %c0_i32_1 = arith.constant 0 : i32
    return %c0_i32, %c0_i32_0 : i32, i32
  }
  func.func @transform_7(%arg0: i32) -> (i32, i32, i32) {
    %c0_i32 = arith.constant 0 : i32
    %c0_i32_0 = arith.constant 0 : i32
    %c0_i32_1 = arith.constant 0 : i32
    %c0_i32_2 = arith.constant 0 : i32
    return %c0_i32, %c0_i32_0, %c0_i32_1 : i32, i32, i32
  }
  func.func @transform_8(%arg0: i32) -> (i32, i32) {
    %c0_i32 = arith.constant 0 : i32
    %c0_i32_0 = arith.constant 0 : i32
    %c0_i32_1 = arith.constant 0 : i32
    return %c0_i32, %c0_i32_0 : i32, i32
  }
  func.func @transform_9(%arg0: i32) -> (i32, i32) {
    %c0_i32 = arith.constant 0 : i32
    %c0_i32_0 = arith.constant 0 : i32
    %c0_i32_1 = arith.constant 0 : i32
    return %c0_i32, %c0_i32_0 : i32, i32
  }
  func.func @transform_10(%arg0: i32) -> (i32, i32) {
    %c0_i32 = arith.constant 0 : i32
    %c0_i32_0 = arith.constant 0 : i32
    %c0_i32_1 = arith.constant 0 : i32
    return %c0_i32, %c0_i32_0 : i32, i32
  }
  func.func @transform_11(%arg0: i32) -> (i32, i32) {
    %c0_i32 = arith.constant 0 : i32
    %c0_i32_0 = arith.constant 0 : i32
    %c0_i32_1 = arith.constant 0 : i32
    return %c0_i32, %c0_i32_0 : i32, i32
  }
  func.func @transform_12(%arg0: i32) -> (i32, i32) {
    %c0_i32 = arith.constant 0 : i32
    %c0_i32_0 = arith.constant 0 : i32
    %c0_i32_1 = arith.constant 0 : i32
    return %c0_i32, %c0_i32_0 : i32, i32
  }
  func.func @transform_13(%arg0: i32) -> (i32, i32, i32) {
    %c0_i32 = arith.constant 0 : i32
    %c0_i32_0 = arith.constant 0 : i32
    %c0_i32_1 = arith.constant 0 : i32
    return %arg0, %c0_i32, %c0_i32_0 : i32, i32, i32
  }
}

</mosaic_0001>

<bundles_post_ra>
// kernel: tpu_custom_call.1
= control target key start
LH: loop header
LB: loop body
LE: loop exit
PB: predicated region body
PF: predicated region fallthrough
CT: control target
= control target key end

     0   :  { %s3039_s0 = inlined_call_operand.hbm [shape: bf16[2,16,640], index: 0, kind: input, shape index: {}]   ;;  %s3040_s1 = inlined_call_operand.hbm [shape: bf16[5,16,16], index: 1, kind: input, shape index: {}]   ;;  %s3041_s2 = inlined_call_operand.vmem [shape: f32[16,1], index: 2, kind: input, shape index: {}]   ;;  %s3042_s3 = inlined_call_operand.vmem [shape: f32[1,512], index: 3, kind: input, shape index: {}]   ;;  %s3043_s4 = inlined_call_operand.vmem [shape: bf16[3,8,16], index: 4, kind: input, shape index: {}]   ;;  %s3044_s5 = inlined_call_operand.vmem [shape: f32[8,1], index: 5, kind: input, shape index: {}]   ;;  %s3045_s6 = inlined_call_operand.vmem [shape: f32[1,384], index: 6, kind: input, shape index: {}]   ;;  %s3046_s7 = inlined_call_operand.vmem [shape: bf16[5,4,8], index: 7, kind: input, shape index: {}]   ;;  %s3047_s8 = inlined_call_operand.vmem [shape: f32[4,1], index: 8, kind: input, shape index: {}]   ;;  %s3048_s9 = inlined_call_operand.hbm [shape: bf16[512,128], index: 9, kind: input, shape index: {}]   ;;  %s3049_s10 = inlined_call_operand.vmem [shape: f32[1,128], index: 10, kind: input, shape index: {}]   ;;  %s3050_s11 = inlined_call_operand.hbm [shape: bf16[128,128], index: 11, kind: input, shape index: {}]   ;;  %s3051_s12 = inlined_call_operand.vmem [shape: f32[1,128], index: 12, kind: input, shape index: {}]   ;;  %s3052_s13 = inlined_call_operand.hbm [shape: f32[2,1,128], index: 13, kind: output, shape index: {}]  }
   0x1   :  { %3059 = sst [smem:[#allocation22_spill]] %s3040_s1 }
   0x2   :  { %3060 = sst [smem:[#allocation23_spill]] %s3048_s9 }
   0x3   :  { %3061 = sst [smem:[#allocation24_spill]] %s3050_s11 }
   0x4   :  { %18 = vsyncpa [#allocation4], 0 }
   0x5   :  { %20 = vsyncpa [#allocation4 + $0x1], 0 }
   0x6   :  { %21 = vsyncpa [#allocation7], 0 }
   0x7   :  { %22 = vsyncpa [#allocation10], 0 }
   0x8   :  { %23 = vsyncpa [#allocation5], 0 }
   0x9   :  { %25 = vsyncpa [#allocation5 + $0x1], 0  ;;  %s2697_s25 = smov 0   ;;  %s2699_s26 = smov 0  }
   0xa   :  { %s2701_s27 = smov 0   ;;  %s2703_s28 = smov 0  }
   0xb LB: > { %3062 = sst [smem:[#allocation16_spill]] %s2601_s25  ;;  %s2718_s29 = sadd.s32 4294967295, %s2613_s28   ;;  %s2613_s28 = sphi %s2703_s28, %s3081_s28   ;;  %s2609_s27 = sphi %s2701_s27, %s3083_s27   ;;  %s2605_s26 = sphi %s2699_s26, %s3085_s26   ;;  %s2601_s25 = sphi %s2697_s25, %s3084_s25  }
   0xc   : > { %3063 = sst [smem:[#allocation17_spill]] %s2609_s27  ;;  %s2016_s30 = sadd.s32 4294967294, %s2613_s28  }
   0xd   : > { %3064 = sst [smem:[#allocation18_spill]] %s2613_s28  ;;  %p51_p0 = scmp.ne.s32.totalorder %s2605_s26, %s2601_s25 }
   0xe   : > { %p52_p1 = scmp.eq.s32.totalorder %s2718_s29, 0  ;;  %p327_p2 = scmp.eq.s32.totalorder %s2718_s29, 1 }
   0xf   : > { %p333_p3 = scmp.eq.s32.totalorder %s2016_s30, 1  ;;  %p2017_p5 = scmp.ge.s32.totalorder %s2613_s28, 1 }
  0x10   : > { %p2727_p4 = por %p52_p1, %p51_p0  ;;  %p340_p7 = scmp.lt.s32.totalorder %s2613_s28, 3 }
  0x11   : > { %p2732_p6 = por %p333_p3, %p51_p0  ;;  %s3068_s1 = sld [smem:[#allocation22_spill]] }
  0x12   : > { %p2740_p8 = pnand %p2017_p5, %p340_p7  ;;  %s2615_s20 = smov [#allocation6]  }
  0x13   : > { %s3066_s15 = scalar_select %p2732_p6, 1, 0 }
  0x14   : > { %p2346_p9 = pneg %p2740_p8  ;;  %s353_s21 = sshll.u32 %s2615_s20, 4  ;;  %s354_s21 = int_to_ptr.vmem [resolvable:$true] %s353_s21 }
  0x15   : > { %3067 = sst [smem:[#allocation19_spill]] %s3066_s15  ;;  %s2616_s16 = smov 64  }
  0x16   : > { %p2748_p10 = pnand %p2346_p9, %p52_p1  ;;  %s3071_s9 = sld [smem:[#allocation23_spill]] }
  0x17   : > { %s351_s18 = sshll.u32 %s3068_s1, 4  ;;  %s2617_s17 = smov 4   ;;  %s352_s18 = int_to_ptr.hbm [resolvable:$true] %s351_s18 }
  0x18   : > { %2349 = dma.hbm_to_vmem [thread:$0]  (!%p2748_p10), %s352_s18, 640, %s354_s21, [#allocation7], %s2616_s16, %s2616_s16, %s2617_s17  }
  0x19   : > { %s2618_s20 = smov [#allocation8]   ;;  %s3072_s11 = sld [smem:[#allocation24_spill]] }
  0x1a   : > { %s388_s1 = sshll.u32 %s2618_s20, 4  ;;  %s2619_s24 = smov [#allocation9]   ;;  %s389_s1 = int_to_ptr.vmem [resolvable:$true] %s388_s1 }
  0x1b   : > { %s2764_s18 = sadd.s32 1, %s2613_s28   ;;  %s38_s20 = sadd.s32 1, %s2609_s27 }
  0x1c   : > { %s386_s30 = sshll.u32 %s3071_s9, 4  ;;  %s405_s9 = sshll.u32 %s2619_s24, 4  ;;  %s387_s30 = int_to_ptr.hbm [resolvable:$true] %s386_s30  ;;  %s406_s9 = int_to_ptr.vmem [resolvable:$true] %s405_s9 }
  0x1d   : > { %2352 = dma.hbm_to_vmem [thread:$0]  (!%p2748_p10), %s387_s30, 4096, %s389_s1, [#allocation7], %s2616_s16, %s2616_s16, %s2617_s17  }
  0x1e   : > { %3073 = sst [smem:[#allocation20_spill]] %s2764_s18  ;;  %s35_s21 = ssub.s32 %s2613_s28, %s2764_s18 }
  0x1f   : > { %s403_s23 = sshll.u32 %s3072_s11, 4  ;;  %p36_p12 = scmp.eq.s32.totalorder %s35_s21, 0  ;;  %s404_s23 = int_to_ptr.hbm [resolvable:$true] %s403_s23 }
  0x20   : > { %2355 = dma.hbm_to_vmem [thread:$0]  (!%p2748_p10), %s404_s23, 1024, %s406_s9, [#allocation10], %s2616_s16, %s2616_s16, %s2617_s17  }
  0x21   : > { %p45_p13 = scmp.ne.s32.totalorder %s2609_s27, %s2605_s26  ;;  %p46_p0 = scmp.eq.s32.totalorder %s2613_s28, 0 }
  0x22   : > { %p2367_p3 = scmp.lt.s32.totalorder %s2613_s28, 2  ;;  %s422_s15 = sand.u32 1, %s2609_s27  }
  0x23   : > { %s2776_s25 = scalar_select %p36_p12, %s2609_s27, %s38_s20  }
  0x24   : > { %p47_p5 = por %p46_p0, %p45_p13  ;;  %p2780_p7 = por %p327_p2, %p45_p13 }
  0x25   : > { %3074 = sst [smem:[#allocation21_spill]] %s2776_s25  ;;  %s2328_s30 = smul.u32 40, %s2613_s28 }
  0x26   : > { %s2327_s24 = smul.u32 40, %s422_s15  ;;  %p2789_p9 = pnand %p2367_p3, %p47_p5 }
  0x27   : > { %s431_s9 = scalar_lea.hbm %s3039_s0, %s2328_s30  ;;  %s423_s20 = scalar_lea.sflag [#allocation4], %s422_s15 }
  0x28   : > { %s432_s17 = sshll.u32 %s431_s9, 4  ;;  %s426_s23 = scalar_lea.vmem [#allocation3], %s2327_s24  ;;  %s433_s17 = int_to_ptr.hbm [resolvable:$true] %s432_s17 }
  0x29   : > { %s434_s21 = sshll.u32 %s426_s23, 4  ;;  %s2509_s25 = sshra.s32 %s433_s17, 4  ;;  %s435_s21 = int_to_ptr.vmem [resolvable:$true] %s434_s21  ;;  %s2510_s25 = int_to_ptr.hbm [resolvable:$true] %s2509_s25 }
  0x2a   : > { %s2511_s27 = scalar_lea.hbm %s2510_s25, 40  ;;  %p2513_p10 = pneg %p2789_p9 }
  0x2b   : > { %p2512_p2 = scmp.ne.s32.totalorder %s2510_s25, %s2511_s27  ;;  %s2516_s22 = scalar_lea.hbm %s3039_s0, 80 }
  0x2c   : > { %p2517_p0 = scmp.lt.s32.totalorder %s2510_s25, %s3039_s0  ;;  %p2518_p3 = scmp.lt.s32.totalorder %s2516_s22, %s2511_s27 }
  0x2d   : > { %p2514_p12 = pnand %p2513_p10, %p2512_p2 }
  0x2e   : > { %p2519_p5 = por %p2518_p3, %p2517_p0 }
  0x2f   : > { %p2515_p13 = pneg %p2514_p12 }
  0x31   : > { %p2520_p11 = pnand %p2519_p5, %p2515_p13 }
  0x33   : > { %2523 = shalt.err (!%p2520_p11)
}
  0x34   : > { %s2620_s15 = smov 320   ;;  %s2621_s24 = smov 20  }
  0x35   : > { %2359 = dma.hbm_to_vmem [thread:$0]  (!%p2789_p9), %s433_s17, 640, %s435_s21, %s423_s20, %s2620_s15, %s2620_s15, %s2621_s24  }
  0x36   : > { %446 = sbr.rel (%p2740_p8) target bundleno = 1404 (0x57c), region = 72  ;;  %s2806_s9 = sand.u32 (!%p2740_p8), 1, %s2605_s26  }
  0x37   : > { %s2329_s28 = smul.u32 (!%p2740_p8), 40, %s2806_s9  ;;  %s449_s18 = scalar_lea.sflag (!%p2740_p8), [#allocation4], %s2806_s9 }
  0x39   : > { %s452_s27 = scalar_lea.vmem (!%p2740_p8), [#allocation3], %s2329_s28 }
  0x3b   : > { %2584 = dma.done.wait (%p2727_p4), %s449_s18, 640  }
  0x3c   : > { %2586 = vsyncadd (%p2727_p4), %s449_s18, 4294966656 }
  0x3d   : > { %2588 = dma.done.wait (%p52_p1), [#allocation7], 4736  }
  0x3e   : > { %2590 = vsyncadd (%p52_p1), [#allocation7], 4294962560 }
  0x3f   : > { %2592 = dma.done.wait (%p52_p1), [#allocation10], 1024  }
  0x40   : > { %2594 = vsyncadd (%p52_p1), [#allocation10], 4294966272  ;;  %v2041_v0 = vld [vmem:[%s452_s27 + $0x8] sm:$0xf]  ;;  %v2280_v1 = vld [vmem:[%s452_s27 + $0x18] sm:$0xf0]  ;;  %s1917_s11 = scalar_lea.hbm %s3052_s13, %s2718_s29 }
  0x41   : > { %v2033_v2 = vld [vmem:[%s452_s27] sm:$0xf]  ;;  %v2042_v3 = vor.u32 %v2280_v1, %v2041_v0  ;;  %v2279_v4 = vld [vmem:[%s452_s27 + $0x10] sm:$0xf0]  ;;  %v2049_v6 = vld [vmem:[%s452_s27 + $0x10] sm:$0xf] }
  0x42   : > { %v2034_v5 = vor.u32 %v2279_v4, %v2033_v2  ;;  %s2622_s14 = smov 127   ;;  %v2281_v7 = vld [vmem:[%s452_s27 + $0x20] sm:$0xf0]  ;;  %v2278_v8 = vld [vmem:[%s452_s27 + $0xc] sm:$0xf]  ;;  %s2623_s19 = smov 126  }
  0x43   : > { %552 = vrot.lane.b32.xlu1 %v2042_v3, %s2622_s14  ;;  %v2043_v9 = vld [vmem:[%s452_s27 + $0x1c] sm:$0xf0]  ;;  %v2050_v10 = vor.u32 %v2281_v7, %v2049_v6  ;;  %v2277_v11 = vld [vmem:[%s452_s27 + $0x4] sm:$0xf]  ;;  %v2035_v12 = vld [vmem:[%s452_s27 + $0x14] sm:$0xf0] }
  0x44   : > { %548 = vrot.lane.b32.xlu0 %v2034_v5, %s2622_s14  ;;  %v2046_v13 = vor.u32 %v2278_v8, %v2043_v9  ;;  %v2038_v14 = vor.u32 %v2277_v11, %v2035_v12  ;;  %s2624_s25 = smov 125   ;;  %s2625_s16 = smov 124   ;;  %vm558_vm0 = vcmask 1039360   ;;  %v2283_v23 = vld [vmem:[#allocation6 + $0x8] sm:$0xff]  ;;  %vm567_vm1 = vcmask 130048   ;;  %v2282_v34 = vld [vmem:[#allocation6] sm:$0xff] }
  0x45   : > { %556 = vrot.lane.b32.xlu2 %v2050_v10, %s2622_s14  ;;  %vm713_vm2 = vcmask 1031168   ;;  %vm807_vm3 = vcmask 1022976   ;;  %v2284_v45 = vld [vmem:[#allocation6 + $0x10] sm:$0xff]  ;;  %vm901_vm4 = vcmask 1014784   ;;  %v2626_v53 = vmov 0   ;;  %v2285_v57 = vld [vmem:[#allocation6 + $0x18] sm:$0xff] }
  0x46   : > { %v978_v50 = vld [vmem:[%s3041_s2 + $0x8] sm:$0xff]  ;;  %v977_v51 = vld [vmem:[%s3041_s2] sm:$0xff]  ;;  %2417 = vset.pattern.permute.xlu0 %v2626_v53  ;;  %2416 = vset.pattern.permute.xlu2 %v2626_v53  ;;  %v2286_v58 = vld [vmem:[#allocation6 + $0x20] sm:$0xff]  ;;  %vm1256_vm5 = vcmask 1043456   ;;  %vm1252_vm6 = vcmask 64512   ;;  %s1909_s15 = scalar_lea.sflag [#allocation5], %s2806_s9 }
  0x47   : > { %2418 = vset.pattern.permute.xlu1 %v2626_v53  ;;  %s2559_s27 = scalar_lea.hbm %s3052_s13, 2 }
  0x4b   : > { %554 = vrot.lane.b32.xlu1 %v2046_v13, %s2622_s14 }
  0x4c   : > { %550 = vrot.lane.b32.xlu0 %v2038_v14, %s2622_s14 }
  0x4d   : > { %703 = vrot.lane.b32.xlu2 %v2034_v5, %s2623_s19 }
  0x53   : > { %707 = vrot.lane.b32.xlu1 %v2042_v3, %s2623_s19 }
  0x54   : > { %705 = vrot.lane.b32.xlu0 %v2038_v14, %s2623_s19 }
  0x55   : > { %709 = vrot.lane.b32.xlu2 %v2046_v13, %s2623_s19 }
  0x5b   : > { %797 = vrot.lane.b32.xlu1 %v2034_v5, %s2624_s25 }
  0x5c   : > { %711 = vrot.lane.b32.xlu0 %v2050_v10, %s2623_s19 }
  0x5d   : > { %799 = vrot.lane.b32.xlu2 %v2038_v14, %s2624_s25 }
  0x63   : > { %803 = vrot.lane.b32.xlu1 %v2046_v13, %s2624_s25 }
  0x64   : > { %801 = vrot.lane.b32.xlu0 %v2042_v3, %s2624_s25 }
  0x65   : > { %805 = vrot.lane.b32.xlu2 %v2050_v10, %s2624_s25 }
  0x6b   : > { %893 = vrot.lane.b32.xlu1 %v2038_v14, %s2625_s16 }
  0x6c   : > { %891 = vrot.lane.b32.xlu0 %v2034_v5, %s2625_s16 }
  0x6d   : > { %895 = vrot.lane.b32.xlu2 %v2042_v3, %s2625_s16 }
  0x73   : > { %899 = vrot.lane.b32.xlu1 %v2050_v10, %s2625_s16 }
  0x74   : > { %897 = vrot.lane.b32.xlu0 %v2046_v13, %s2625_s16 }
  0x75   : > { %981 = vperm.xlu2 %2416, %v977_v51  }
  0x7c   : > { %986 = vperm.xlu0 %2417, %v978_v50  }
  0x9f   : > { %v557_v15 = vpop.permute.xlu2 %556 }
  0xa7   : > { %v704_v17 = vpop.permute.xlu2 %703 }
  0xaf   : > { %v710_v26 = vpop.permute.xlu2 %709 }
  0xb5   : > { %v553_v16 = vpop.permute.xlu1 %552 }
  0xb6   : > { %v549_v18 = vpop.permute.xlu0 %548 }
  0xb7   : > { %v800_v32 = vpop.permute.xlu2 %799 }
  0xbd   : > { %v555_v19 = vpop.permute.xlu1 %554 }
  0xbe   : > { %v551_v20 = vpop.permute.xlu0 %550  ;;  %v561_v21 = vsel %vm558_vm0, %v553_v16, %v555_v19  ;;  %v562_v22 = vsel %vm558_vm0, %v555_v19, %v557_v15 }
  0xbf   : > { %v559_v24 = vsel %vm558_vm0, %v549_v18, %v551_v20  ;;  %v560_v25 = vsel %vm558_vm0, %v551_v20, %v553_v16  ;;  %606 = vmatpush.bf16.msra.mxu2 %v561_v21  ;;  %620 = vmatpush.bf16.msra.mxu3 %v562_v22  ;;  %v806_v38 = vpop.permute.xlu2 %805 }
  0xc0   : > { %578 = vmatpush.bf16.msra.mxu0 %v559_v24  ;;  %592 = vmatpush.bf16.msra.mxu1 %v560_v25 }
  0xc2   : > { %2053 = vmatmul.msk.bf16.vlgmr.msra.gmra.mxu2 %vm567_vm1, %v2283_v23  ;;  %2054 = vmatmul.msk.bf16.vlgmr.msra.gmra.mxu3 %vm567_vm1, %v2283_v23 }
  0xc3   : > { %2051 = vmatmul.msk.bf16.vlgmr.msra.gmra.mxu0 %vm567_vm1, %v2283_v23  ;;  %2052 = vmatmul.msk.bf16.vlgmr.msra.gmra.mxu1 %vm567_vm1, %v2283_v23 }
  0xc4   : > { %646 = vmatpush.bf16.msrb.mxu0 %v2034_v5  ;;  %660 = vmatpush.bf16.msrb.mxu1 %v2038_v14 }
  0xc5   : > { %674 = vmatpush.bf16.msrb.mxu2 %v2042_v3  ;;  %688 = vmatpush.bf16.msrb.mxu3 %v2046_v13  ;;  %v708_v27 = vpop.permute.xlu1 %707 }
  0xc6   : > { %v706_v28 = vpop.permute.xlu0 %705  ;;  %v716_v29 = vsel %vm713_vm2, %v708_v27, %v710_v26 }
  0xc7   : > { %v714_v30 = vsel %vm713_vm2, %v704_v17, %v706_v28  ;;  %v715_v31 = vsel %vm713_vm2, %v706_v28, %v708_v27  ;;  %v896_v47 = vpop.permute.xlu2 %895 }
  0xc8   : > { %732 = vmatpush.bf16.msra.mxu0 %v714_v30  ;;  %746 = vmatpush.bf16.msra.mxu1 %v715_v31 }
  0xc9   : > { %760 = vmatpush.bf16.msra.mxu2 %v716_v29 }
  0xcd   : > { %v798_v33 = vpop.permute.xlu1 %797 }
  0xce   : > { %v712_v35 = vpop.permute.xlu0 %711  ;;  %v808_v37 = vsel %vm807_vm3, %v798_v33, %v800_v32 }
  0xcf   : > { %v717_v36 = vsel %vm713_vm2, %v710_v26, %v712_v35  ;;  %v982_v33 = vpop.permute.xlu2 %981 }
  0xd0   : > { %774 = vmatpush.bf16.msra.mxu3 %v717_v36 }
  0xd2   : > { %2061 = vmatmul.msk.bf16.vlgmr.msrb.gmra.mxu2 %vm567_vm1, %v2282_v34  ;;  %2062 = vmatmul.msk.bf16.vlgmr.msrb.gmra.mxu3 %vm567_vm1, %v2282_v34 }
  0xd3   : > { %2059 = vmatmul.msk.bf16.vlgmr.msrb.gmra.mxu0 %vm567_vm1, %v2282_v34  ;;  %2060 = vmatmul.msk.bf16.vlgmr.msrb.gmra.mxu1 %vm567_vm1, %v2282_v34 }
  0xd4   : > { %826 = vmatpush.bf16.msrb.mxu0 %v808_v37 }
  0xd5   : > { %v804_v39 = vpop.permute.xlu1 %803 }
  0xd6   : > { %v811_v40 = vsel %vm807_vm3, %v804_v39, %v806_v38  ;;  %v802_v41 = vpop.permute.xlu0 %801  ;;  %v2887_v38 = vld [vmem:[%s3042_s3] sm:$0xf] }
  0xd7   : > { %v809_v42 = vsel %vm807_vm3, %v800_v32, %v802_v41  ;;  %v810_v43 = vsel %vm807_vm3, %v802_v41, %v804_v39  ;;  %868 = vmatpush.bf16.msrb.mxu3 %v811_v40 }
  0xd8   : > { %840 = vmatpush.bf16.msrb.mxu1 %v809_v42  ;;  %854 = vmatpush.bf16.msrb.mxu2 %v810_v43 }
  0xdd   : > { %v894_v44 = vpop.permute.xlu1 %893 }
  0xde   : > { %v892_v46 = vpop.permute.xlu0 %891  ;;  %v903_v49 = vsel %vm901_vm4, %v894_v44, %v896_v47 }
  0xdf   : > { %v902_v48 = vsel %vm901_vm4, %v892_v46, %v894_v44  ;;  %v1008_v46 = vperm.slane %v2887_v38, 1 }
  0xe2   : > { %2069 = vmatmul.msk.bf16.vlgmr.msra.gmra.mxu2 %vm567_vm1, %v2284_v45  ;;  %2070 = vmatmul.msk.bf16.vlgmr.msra.gmra.mxu3 %vm567_vm1, %v2284_v45 }
  0xe3   : > { %2067 = vmatmul.msk.bf16.vlgmr.msra.gmra.mxu0 %vm567_vm1, %v2284_v45  ;;  %2068 = vmatmul.msk.bf16.vlgmr.msra.gmra.mxu1 %vm567_vm1, %v2284_v45  ;;  %v1007_v45 = vperm.slane %v2887_v38, 0 }
  0xe4   : > { %920 = vmatpush.bf16.msra.mxu0 %v902_v48  ;;  %934 = vmatpush.bf16.msra.mxu1 %v903_v49 }
  0xe5   : > { %v900_v52 = vpop.permute.xlu1 %899 }
  0xe6   : > { %v898_v54 = vpop.permute.xlu0 %897 }
  0xe7   : > { %v904_v55 = vsel %vm901_vm4, %v896_v47, %v898_v54  ;;  %v905_v56 = vsel %vm901_vm4, %v898_v54, %v900_v52 }
  0xe8   : > { %948 = vmatpush.bf16.msra.mxu2 %v904_v55  ;;  %962 = vmatpush.bf16.msra.mxu3 %v905_v56 }
  0xf2   : > { %2077 = vmatmul.msk.bf16.vlgmr.msrb.gmra.mxu2 %vm567_vm1, %v2285_v57  ;;  %2078 = vmatmul.msk.bf16.vlgmr.msrb.gmra.mxu3 %vm567_vm1, %v2285_v57 }
  0xf3   : > { %2075 = vmatmul.msk.bf16.vlgmr.msrb.gmra.mxu0 %vm567_vm1, %v2285_v57  ;;  %2076 = vmatmul.msk.bf16.vlgmr.msrb.gmra.mxu1 %vm567_vm1, %v2285_v57 }
 0x102   : > { %2085 = vmatmul.msk.bf16.vlgmr.msra.gmra.mxu2 %vm567_vm1, %v2286_v58  ;;  %2086 = vmatmul.msk.bf16.vlgmr.msra.gmra.mxu3 %vm567_vm1, %v2286_v58 }
 0x103   : > { %2083 = vmatmul.msk.bf16.vlgmr.msra.gmra.mxu0 %vm567_vm1, %v2286_v58  ;;  %2084 = vmatmul.msk.bf16.vlgmr.msra.gmra.mxu1 %vm567_vm1, %v2286_v58 }
 0x140   : > { %v580_v59 = vpop.f32.mrf.mxu0  ;;  %v594_v60 = vpop.f32.mrf.mxu1 }
 0x145   : > { %v608_v61 = vpop.f32.mrf.mxu2  ;;  %v622_v62 = vpop.f32.mrf.mxu3 }
 0x148   : > { %v582_v63 = vpop.f32.mrf.mxu0  ;;  %v596_v0 = vpop.f32.mrf.mxu1 }
 0x14d   : > { %v610_v1 = vpop.f32.mrf.mxu2  ;;  %v624_v2 = vpop.f32.mrf.mxu3 }
 0x150   : > { %v648_v3 = vpop.f32.mrf.mxu0  ;;  %v662_v4 = vpop.f32.mrf.mxu1 }
 0x151   : > { %v649_v25 = vadd.f32 %v648_v3, %v580_v59  ;;  %v663_v26 = vadd.f32 %v662_v4, %v594_v60  ;;  %v987_v3 = vpop.permute.xlu0 %986 }
 0x155   : > { %v676_v5 = vpop.f32.mrf.mxu2  ;;  %v690_v6 = vpop.f32.mrf.mxu3 }
 0x156   : > { %v677_v34 = vadd.f32 %v676_v5, %v608_v61  ;;  %v691_v35 = vadd.f32 %v690_v6, %v622_v62  ;;  %v1009_v5 = vperm.slane %v2887_v38, 2 }
 0x158   : > { %v650_v7 = vpop.f32.mrf.mxu0  ;;  %v664_v8 = vpop.f32.mrf.mxu1 }
 0x159   : > { %v651_v41 = vadd.f32 %v650_v7, %v582_v63  ;;  %v665_v42 = vadd.f32 %v664_v8, %v596_v0  ;;  %v1010_v7 = vperm.slane %v2887_v38, 3 }
 0x15d   : > { %v678_v9 = vpop.f32.mrf.mxu2  ;;  %v692_v10 = vpop.f32.mrf.mxu3 }
 0x15e   : > { %v679_v57 = vadd.f32 %v678_v9, %v610_v1  ;;  %v693_v58 = vadd.f32 %v692_v10, %v624_v2 }
 0x160   : > { %v734_v11 = vpop.f32.mrf.mxu0  ;;  %v748_v12 = vpop.f32.mrf.mxu1 }
 0x161   : > { %v781_v27 = vadd.f32 %v734_v11, %v649_v25  ;;  %v782_v28 = vadd.f32 %v748_v12, %v663_v26 }
 0x165   : > { %v762_v13 = vpop.f32.mrf.mxu2  ;;  %v776_v14 = vpop.f32.mrf.mxu3 }
 0x166   : > { %v783_v43 = vadd.f32 %v762_v13, %v677_v34  ;;  %v784_v44 = vadd.f32 %v776_v14, %v691_v35 }
 0x168   : > { %v736_v15 = vpop.f32.mrf.mxu0  ;;  %v750_v16 = vpop.f32.mrf.mxu1 }
 0x169   : > { %v785_v51 = vadd.f32 %v736_v15, %v651_v41  ;;  %v786_v52 = vadd.f32 %v750_v16, %v665_v42 }
 0x16d   : > { %v764_v17 = vpop.f32.mrf.mxu2  ;;  %v778_v18 = vpop.f32.mrf.mxu3 }
 0x16e   : > { %v787_v1 = vadd.f32 %v764_v17, %v679_v57  ;;  %v788_v2 = vadd.f32 %v778_v18, %v693_v58  ;;  %v1208_v57 = vld [vmem:[%s3044_s5] sm:$0xff] }
 0x170   : > { %v828_v19 = vpop.f32.mrf.mxu0  ;;  %v842_v20 = vpop.f32.mrf.mxu1 }
 0x171   : > { %v875_v31 = vadd.f32 %v828_v19, %v781_v27  ;;  %v876_v32 = vadd.f32 %v842_v20, %v782_v28 }
 0x175   : > { %v856_v21 = vpop.f32.mrf.mxu2  ;;  %v870_v22 = vpop.f32.mrf.mxu3 }
 0x176   : > { %v877_v49 = vadd.f32 %v856_v21, %v783_v43  ;;  %v878_v50 = vadd.f32 %v870_v22, %v784_v44 }
 0x178   : > { %v830_v23 = vpop.f32.mrf.mxu0  ;;  %v844_v24 = vpop.f32.mrf.mxu1 }
 0x179   : > { %v879_v61 = vadd.f32 %v830_v23, %v785_v51  ;;  %v880_v62 = vadd.f32 %v844_v24, %v786_v52 }
 0x17d   : > { %v858_v29 = vpop.f32.mrf.mxu2  ;;  %v872_v30 = vpop.f32.mrf.mxu3 }
 0x17e   : > { %v881_v19 = vadd.f32 %v858_v29, %v787_v1  ;;  %v882_v20 = vadd.f32 %v872_v30, %v788_v2 }
 0x180   : > { %v922_v36 = vpop.f32.mrf.mxu0  ;;  %v936_v37 = vpop.f32.mrf.mxu1 }
 0x181   : > { %v969_v39 = vadd.f32 %v922_v36, %v875_v31  ;;  %v970_v40 = vadd.f32 %v936_v37, %v876_v32 }
 0x183   : > { %v989_v47 = vadd.f32 %v982_v33, %v969_v39  ;;  %v990_v48 = vadd.f32 %v982_v33, %v970_v40 }
 0x185   : > { %v997_v53 = vmax.f32 %v989_v47, 0.0  ;;  %v998_v54 = vmax.f32 %v990_v48, 0.0  ;;  %v950_v55 = vpop.f32.mrf.mxu2  ;;  %v964_v56 = vpop.f32.mrf.mxu3 }
 0x186   : > { %v971_v59 = vadd.f32 %v950_v55, %v877_v49  ;;  %v972_v60 = vadd.f32 %v964_v56, %v878_v50  ;;  %v1027_v50 = vld [vmem:[%s3043_s4] sm:$0xf]  ;;  %v2087_v56 = vld [vmem:[%s3043_s4 + $0x4] sm:$0xf] }
 0x187   : > { %v1015_v63 = vmul.f32 %v1007_v45, %v997_v53  ;;  %v1016_v0 = vmul.f32 %v1008_v46, %v998_v54 }
 0x188   : > { %v991_v4 = vadd.f32 %v982_v33, %v971_v59  ;;  %v992_v6 = vadd.f32 %v982_v33, %v972_v60  ;;  %v924_v8 = vpop.f32.mrf.mxu0  ;;  %v938_v11 = vpop.f32.mrf.mxu1 }
 0x189   : > { %v973_v12 = vadd.f32 %v924_v8, %v879_v61  ;;  %v974_v13 = vadd.f32 %v938_v11, %v880_v62  ;;  %v1023_v14 = vpack.c.bf16 %v1016_v0, %v1015_v63 }
 0x18a   : > { %v999_v9 = vmax.f32 %v991_v4, 0.0  ;;  %v1000_v10 = vmax.f32 %v992_v6, 0.0 }
 0x18b   : > { %v993_v15 = vadd.f32 %v987_v3, %v973_v12  ;;  %v994_v16 = vadd.f32 %v987_v3, %v974_v13  ;;  %v1035_v37 = vunpack.c.h.b16 %v1023_v14  ;;  %v1034_v29 = vunpack.c.l.b16 %v1023_v14 }
 0x18c   : > { %v1017_v21 = vmul.f32 %v1009_v5, %v999_v9  ;;  %v1018_v22 = vmul.f32 %v1010_v7, %v1000_v10 }
 0x18d   : > { %v1001_v23 = vmax.f32 %v993_v15, 0.0  ;;  %v1002_v24 = vmax.f32 %v994_v16, 0.0  ;;  %v952_v25 = vpop.f32.mrf.mxu2  ;;  %v966_v26 = vpop.f32.mrf.mxu3 }
 0x18e   : > { %v1024_v27 = vpack.c.bf16 %v1018_v22, %v1017_v21  ;;  %v975_v28 = vadd.f32 %v952_v25, %v881_v19  ;;  %v976_v31 = vadd.f32 %v966_v26, %v882_v20  ;;  %v1220_v22 = vld [vmem:[%s3045_s6] sm:$0x7] }
 0x18f   : > { %v1019_v32 = vmul.f32 %v1007_v45, %v1001_v23  ;;  %v1020_v33 = vmul.f32 %v1008_v46, %v1002_v24 }
 0x190   : > { %v995_v34 = vadd.f32 %v987_v3, %v975_v28  ;;  %v996_v17 = vadd.f32 %v987_v3, %v976_v31  ;;  %v1037_v46 = vunpack.c.h.b16 %v1024_v27  ;;  %v1036_v47 = vunpack.c.l.b16 %v1024_v27 }
 0x191   : > { %v1025_v18 = vpack.c.bf16 %v1020_v33, %v1019_v32  ;;  %v1223_v28 = vperm.slane %v1220_v22, 1 }
 0x192   : > { %v1003_v35 = vmax.f32 %v995_v34, 0.0  ;;  %v1004_v36 = vmax.f32 %v996_v17, 0.0  ;;  %v1222_v17 = vperm.slane %v1220_v22, 0 }
 0x193   : > { %v1039_v38 = vunpack.c.h.b16 %v1025_v18  ;;  %v1038_v30 = vunpack.c.l.b16 %v1025_v18 }
 0x194   : > { %v1021_v39 = vmul.f32 %v1009_v5, %v1003_v35  ;;  %v1022_v40 = vmul.f32 %v1010_v7, %v1004_v36  ;;  %v2094_v5 = vld [vmem:[%s3043_s4 + $0x8] sm:$0xf] }
 0x195   : > { %v1043_v41 = vpack.c.b16 %v1039_v38, %v1035_v37  ;;  %v1042_v42 = vpack.c.b16 %v1038_v30, %v1034_v29  ;;  %v1224_v37 = vperm.slane %v1220_v22, 2 }
 0x196   : > { %v1026_v43 = vpack.c.bf16 %v1022_v40, %v1021_v39 }
 0x197   : > { %1048 = vrot.lane.b32.xlu2 %v1043_v41, %s2622_s14  ;;  %1149 = vrot.lane.b32.xlu0 %v1042_v42, %s2623_s19 }
 0x198   : > { %1046 = vrot.lane.b32.xlu1 %v1042_v42, %s2622_s14  ;;  %1115 = vmatpush.bf16.msrb.mxu3 %v1042_v42  ;;  %v1041_v44 = vunpack.c.h.b16 %v1026_v43  ;;  %v1040_v45 = vunpack.c.l.b16 %v1026_v43 }
 0x19a   : > { %v1045_v48 = vpack.c.b16 %v1041_v44, %v1037_v46  ;;  %v1044_v49 = vpack.c.b16 %v1040_v45, %v1036_v47 }
 0x19b   : > { %2091 = vmatmul.msk.bf16.vlgmr.msrb.gmra.mxu3 %vm567_vm1, %v1027_v50 }
 0x19f   : > { %1052 = vrot.lane.b32.xlu2 %v1045_v48, %s2622_s14  ;;  %1155 = vrot.lane.b32.xlu0 %v1045_v48, %s2623_s19 }
 0x1a0   : > { %1050 = vrot.lane.b32.xlu1 %v1044_v49, %s2622_s14 }
 0x1a7   : > { %1153 = vrot.lane.b32.xlu2 %v1044_v49, %s2623_s19 }
 0x1a8   : > { %1151 = vrot.lane.b32.xlu1 %v1043_v41, %s2623_s19 }
 0x1b0   : > { %1211 = vperm.xlu1 %2418, %v1208_v57  }
 0x1f1   : > { %v1049_v51 = vpop.permute.xlu2 %1048 }
 0x1f9   : > { %v1053_v52 = vpop.permute.xlu2 %1052 }
 0x201   : > { %v1154_v58 = vpop.permute.xlu2 %1153 }
 0x209   : > { %v1150_v53 = vpop.permute.xlu0 %1149 }
 0x20a   : > { %v1047_v54 = vpop.permute.xlu1 %1046 }
 0x20b   : > { %v1054_v55 = vsel %vm558_vm0, %v1047_v54, %v1049_v51 }
 0x20c   : > { %1070 = vmatpush.bf16.msrb.mxu0 %v1054_v55 }
 0x20f   : > { %2088 = vmatmul.msk.bf16.vlgmr.msrb.gmra.mxu0 %vm567_vm1, %v2087_v56 }
 0x210   : > { %1128 = vmatpush.bf16.msra.mxu0 %v1043_v41 }
 0x211   : > { %v1156_v59 = vpop.permute.xlu0 %1155 }
 0x212   : > { %v1159_v60 = vsel %vm713_vm2, %v1154_v58, %v1156_v59  ;;  %v1051_v61 = vpop.permute.xlu1 %1050 }
 0x213   : > { %v1055_v62 = vsel %vm558_vm0, %v1049_v51, %v1051_v61  ;;  %v1056_v63 = vsel %vm558_vm0, %v1051_v61, %v1053_v52  ;;  %v1465_v52 = vld [vmem:[%s3047_s8] sm:$0xf] }
 0x214   : > { %1199 = vmatpush.bf16.msrb.mxu0 %v1159_v60  ;;  %1083 = vmatpush.bf16.msrb.mxu1 %v1055_v62  ;;  %v2098_v61 = vld [vmem:[%s3046_s7 + $0x2] sm:$0x3] }
 0x215   : > { %1096 = vmatpush.bf16.msrb.mxu2 %v1056_v63 }
 0x217   : > { %2089 = vmatmul.msk.bf16.vlgmr.msrb.gmra.mxu1 %vm567_vm1, %v2087_v56 }
 0x218   : > { %1141 = vmatpush.bf16.msra.mxu1 %v1044_v49  ;;  %2090 = vmatmul.msk.bf16.vlgmr.msrb.gmra.mxu2 %vm567_vm1, %v2087_v56 }
 0x21a   : > { %v1152_v0 = vpop.permute.xlu1 %1151 }
 0x21b   : > { %v1157_v3 = vsel %vm713_vm2, %v1150_v53, %v1152_v0  ;;  %v1158_v4 = vsel %vm713_vm2, %v1152_v0, %v1154_v58  ;;  %v1233_v53 = vld [vmem:[%s3046_s7] sm:$0x3] }
 0x21c   : > { %1173 = vmatpush.bf16.msra.mxu2 %v1157_v3  ;;  %1186 = vmatpush.bf16.msra.mxu3 %v1158_v4 }
 0x21e   : > { %v1117_v6 = vpop.f32.mrf.mxu3 }
 0x21f   : > { %2092 = vmatmul.msk.bf16.vlgmr.msra.gmra.mxu0 %vm567_vm1, %v1027_v50  ;;  %2096 = vmatmul.msk.bf16.vlgmr.msra.gmra.mxu3 %vm567_vm1, %v2094_v5 }
 0x222   : > { %v1212_v20 = vpop.permute.xlu1 %1211 }
 0x226   : > { %v1119_v7 = vpop.f32.mrf.mxu3 }
 0x227   : > { %2093 = vmatmul.msk.bf16.vlgmr.msra.gmra.mxu1 %vm567_vm1, %v1027_v50 }
 0x228   : > { %2095 = vmatmul.msk.bf16.vlgmr.msra.gmra.mxu2 %vm567_vm1, %v2094_v5 }
 0x22f   : > { %2097 = vmatmul.msk.bf16.vlgmr.msrb.gmra.mxu0 %vm567_vm1, %v2094_v5 }
 0x28c   : > { %v1072_v8 = vpop.f32.mrf.mxu0 }
 0x28d   : > { %v1118_v21 = vadd.f32 %v1117_v6, %v1072_v8 }
 0x294   : > { %v1074_v11 = vpop.f32.mrf.mxu0  ;;  %v1085_v12 = vpop.f32.mrf.mxu1 }
 0x29b   : > { %v1098_v13 = vpop.f32.mrf.mxu2 }
 0x29c   : > { %v1087_v14 = vpop.f32.mrf.mxu1  ;;  %v1130_v1 = vpop.f32.mrf.mxu0 }
 0x29d   : > { %v1131_v10 = vadd.f32 %v1130_v1, %v1085_v12 }
 0x2a2   : > { %v1188_v9 = vpop.f32.mrf.mxu3 }
 0x2a3   : > { %v1100_v2 = vpop.f32.mrf.mxu2  ;;  %v1206_v19 = vadd.f32 %v1188_v9, %v1131_v10  ;;  %v2106_v10 = vld [vmem:[%s3046_s7 + $0x6] sm:$0x3] }
 0x2a4   : > { %v1132_v15 = vpop.f32.mrf.mxu0  ;;  %v1143_v16 = vpop.f32.mrf.mxu1  ;;  %v2103_v2 = vld [vmem:[%s3046_s7 + $0x4] sm:$0x3] }
 0x2a5   : > { %v1215_v23 = vadd.f32 %v1212_v20, %v1206_v19  ;;  %v1144_v26 = vadd.f32 %v1143_v16, %v1098_v13 }
 0x2a7   : > { %v1218_v33 = vmax.f32 %v1215_v23, 0.0  ;;  %v2109_v23 = vld [vmem:[%s3046_s7 + $0x8] sm:$0x3] }
 0x2a9   : > { %v1229_v38 = vmul.f32 %v1223_v28, %v1218_v33 }
 0x2aa   : > { %v1190_v25 = vpop.f32.mrf.mxu3 }
 0x2ab   : > { %v1175_v24 = vpop.f32.mrf.mxu2 }
 0x2ac   : > { %v1205_v27 = vadd.f32 %v1175_v24, %v1118_v21  ;;  %v1145_v31 = vpop.f32.mrf.mxu1  ;;  %v1201_v32 = vpop.f32.mrf.mxu0 }
 0x2ad   : > { %v1207_v18 = vadd.f32 %v1201_v32, %v1144_v26 }
 0x2ae   : > { %v1214_v34 = vadd.f32 %v1212_v20, %v1205_v27 }
 0x2af   : > { %v1216_v36 = vadd.f32 %v1212_v20, %v1207_v18  ;;  %v2302_v18 = vld [vmem:[#allocation8 + $0x78] sm:$0xff] }
 0x2b0   : > { %v1217_v35 = vmax.f32 %v1214_v34, 0.0 }
 0x2b1   : > { %v1219_v30 = vmax.f32 %v1216_v36, 0.0  ;;  %v2318_v36 = vld [vmem:[#allocation8 + $0xf8] sm:$0xff] }
 0x2b2   : > { %v1228_v29 = vmul.f32 %v1222_v17, %v1217_v35  ;;  %v2294_v17 = vld [vmem:[#allocation8 + $0x38] sm:$0xff] }
 0x2b3   : > { %v1177_v39 = vpop.f32.mrf.mxu2  ;;  %v1230_v41 = vmul.f32 %v1224_v37, %v1219_v30  ;;  %v2310_v35 = vld [vmem:[#allocation8 + $0xb8] sm:$0xff]  ;;  %v2293_v37 = vld [vmem:[#allocation8 + $0x30] sm:$0xff] }
 0x2b4   : > { %v1231_v40 = vpack.c.bf16 %v1229_v38, %v1228_v29  ;;  %v1203_v42 = vpop.f32.mrf.mxu0  ;;  %v2301_v38 = vld [vmem:[#allocation8 + $0x70] sm:$0xff] }
 0x2b5   : > { %v1232_v45 = vpack.c.bf16 %v1230_v41, %v1230_v41  ;;  %v2309_v29 = vld [vmem:[#allocation8 + $0xb0] sm:$0xff] }
 0x2b6   : > { %v1238_v43 = vunpack.c.l.b16 %v1231_v40  ;;  %v1239_v44 = vunpack.c.h.b16 %v1231_v40  ;;  %v2317_v30 = vld [vmem:[#allocation8 + $0xf0] sm:$0xff] }
 0x2b7   : > { %v1240_v48 = vunpack.c.l.b16 %v1232_v45 }
 0x2b8   : > { %v1241_v46 = vpack.c.b16 %v1238_v43, %v1238_v43  ;;  %v1242_v47 = vpack.c.b16 %v1239_v44, %v1239_v44 }
 0x2b9   : > { %v1243_v49 = vpack.c.b16 %v1240_v48, %v1240_v48 }
 0x2ba   : > { %1246 = vrot.lane.b32.xlu2 %v1242_v47, %s2622_s14  ;;  %1244 = vrot.lane.b32.xlu1 %v1241_v46, %s2622_s14  ;;  %v1293_v50 = vsel %vm1256_vm5, %v1241_v46, 0  ;;  %v1296_v51 = vsel %vm1256_vm5, %v1242_v47, 0 }
 0x2bb   : > { %1305 = vmatpush.bf16.msrb.mxu3 %v1293_v50  ;;  %1318 = vmatpush.bf16.msra.mxu0 %v1296_v51 }
 0x2bc   : > { %1248 = vrot.lane.b32.xlu0 %v1243_v49, %s2622_s14 }
 0x2be   : > { %2101 = vmatmul.msk.bf16.vlgmr.msrb.gmra.mxu3 %vm1252_vm6, %v1233_v53  ;;  %2102 = vmatmul.msk.bf16.vlgmr.msra.gmra.mxu0 %vm1252_vm6, %v1233_v53 }
 0x2c2   : > { %1328 = vrot.lane.b32.xlu2 %v1242_v47, %s2623_s19  ;;  %1326 = vrot.lane.b32.xlu1 %v1241_v46, %s2623_s19 }
 0x2c4   : > { %1330 = vrot.lane.b32.xlu0 %v1243_v49, %s2623_s19  ;;  %s509_s19 = scalar_lea.vmem [#allocation11], %s2806_s9 }
 0x2ca   : > { %1373 = vrot.lane.b32.xlu2 %v1241_v46, %s2624_s25  ;;  %1422 = vrot.lane.b32.xlu1 %v1242_v47, %s2625_s16 }
 0x2cc   : > { %1375 = vrot.lane.b32.xlu0 %v1242_v47, %s2624_s25 }
 0x2d2   : > { %1424 = vrot.lane.b32.xlu2 %v1243_v49, %s2625_s16  ;;  %1420 = vrot.lane.b32.xlu1 %v1241_v46, %s2625_s16  ;;  %s1921_s16 = sshll.u32 %s1917_s11, 4  ;;  %s1922_s16 = int_to_ptr.hbm [resolvable:$true] %s1921_s16 }
 0x2d3   : > { %s2553_s24 = sshra.s32 %s1922_s16, 4  ;;  %s2554_s24 = int_to_ptr.hbm [resolvable:$true] %s2553_s24 }
 0x2d4   : > { %1377 = vrot.lane.b32.xlu0 %v1243_v49, %s2624_s25  ;;  %s1919_s25 = sshll.u32 %s509_s19, 4  ;;  %s2555_s28 = scalar_lea.hbm %s2554_s24, 1  ;;  %s1920_s25 = int_to_ptr.vmem [resolvable:$true] %s1919_s25 }
 0x2d5   : > { %p2556_p1 = scmp.ne.s32.totalorder %s2554_s24, %s2555_s28  ;;  %p2560_p11 = scmp.lt.s32.totalorder %s2554_s24, %s3052_s13 }
 0x2d6   : > { %p2561_p9 = scmp.lt.s32.totalorder %s2559_s27, %s2555_s28 }
 0x2d7   : > { %p2557_p4 = pnand %p2556_p1, %p2780_p7 }
 0x2d8   : > { %p2562_p2 = por %p2561_p9, %p2560_p11 }
 0x2d9   : > { %p2558_p8 = pneg %p2557_p4 }
 0x2da   : > { %1468 = vperm.xlu2 %2416, %v1465_v52  }
 0x2db   : > { %p2563_p10 = pnand %p2562_p2, %p2558_p8 }
 0x314   : > { %v1247_v54 = vpop.permute.xlu2 %1246 }
 0x31c   : > { %v1329_v55 = vpop.permute.xlu2 %1328 }
 0x324   : > { %v1374_v63 = vpop.permute.xlu2 %1373 }
 0x32c   : > { %v1245_v56 = vpop.permute.xlu1 %1244  ;;  %v1425_v8 = vpop.permute.xlu2 %1424 }
 0x32d   : > { %v1250_v57 = vsel %vm558_vm0, %v1245_v56, %v1247_v54 }
 0x32e   : > { %v1258_v58 = vsel %vm1256_vm5, %v1250_v57, 0  ;;  %v1249_v59 = vpop.permute.xlu0 %1248 }
 0x32f   : > { %v1251_v60 = vsel %vm558_vm0, %v1247_v54, %v1249_v59  ;;  %1270 = vmatpush.bf16.msrb.mxu1 %v1258_v58 }
 0x330   : > { %v1261_v62 = vsel %vm1256_vm5, %v1251_v60, 0 }
 0x331   : > { %1283 = vmatpush.bf16.msrb.mxu2 %v1261_v62 }
 0x332   : > { %2099 = vmatmul.msk.bf16.vlgmr.msrb.gmra.mxu1 %vm1252_vm6, %v2098_v61 }
 0x334   : > { %2100 = vmatmul.msk.bf16.vlgmr.msrb.gmra.mxu2 %vm1252_vm6, %v2098_v61  ;;  %v1327_v0 = vpop.permute.xlu1 %1326  ;;  %v1469_v51 = vpop.permute.xlu2 %1468 }
 0x335   : > { %v1332_v3 = vsel %vm713_vm2, %v1327_v0, %v1329_v55  ;;  %v2300_v0 = vld [vmem:[#allocation8 + $0x68] sm:$0xff] }
 0x336   : > { %v1338_v4 = vsel %vm1256_vm5, %v1332_v3, 0  ;;  %v1331_v5 = vpop.permute.xlu0 %1330  ;;  %v2308_v3 = vld [vmem:[#allocation8 + $0xa8] sm:$0xff] }
 0x337   : > { %v1333_v6 = vsel %vm713_vm2, %v1329_v55, %v1331_v5  ;;  %1350 = vmatpush.bf16.msra.mxu1 %v1338_v4  ;;  %v2316_v4 = vld [vmem:[#allocation8 + $0xe8] sm:$0xff]  ;;  %v2291_v5 = vld [vmem:[#allocation8 + $0x20] sm:$0xff] }
 0x338   : > { %v1341_v7 = vsel %vm1256_vm5, %v1333_v6, 0  ;;  %v2299_v6 = vld [vmem:[#allocation8 + $0x60] sm:$0xff] }
 0x339   : > { %1363 = vmatpush.bf16.msra.mxu2 %v1341_v7  ;;  %v2307_v7 = vld [vmem:[#allocation8 + $0xa0] sm:$0xff] }
 0x33b   : > { %v1320_v25 = vpop.f32.mrf.mxu0 }
 0x33c   : > { %v1423_v11 = vpop.permute.xlu1 %1422 }
 0x33d   : > { %v1427_v12 = vsel %vm901_vm4, %v1423_v11, %v1425_v8  ;;  %v2315_v8 = vld [vmem:[#allocation8 + $0xe0] sm:$0xff] }
 0x33e   : > { %v1435_v13 = vsel %vm1256_vm5, %v1427_v12, 0  ;;  %v1376_v14 = vpop.permute.xlu0 %1375  ;;  %v2298_v12 = vld [vmem:[#allocation8 + $0x58] sm:$0xff] }
 0x33f   : > { %v1379_v1 = vsel %vm807_vm3, %v1374_v63, %v1376_v14  ;;  %1457 = vmatpush.bf16.msrb.mxu2 %v1435_v13  ;;  %v2292_v63 = vld [vmem:[#allocation8 + $0x28] sm:$0xff]  ;;  %v2306_v13 = vld [vmem:[#allocation8 + $0x98] sm:$0xff] }
 0x340   : > { %v1385_v9 = vsel %vm1256_vm5, %v1379_v1, 0  ;;  %v2289_v1 = vld [vmem:[#allocation8 + $0x10] sm:$0xff] }
 0x341   : > { %1397 = vmatpush.bf16.msra.mxu3 %v1385_v9  ;;  %v1307_v24 = vpop.f32.mrf.mxu3  ;;  %v2305_v9 = vld [vmem:[#allocation8 + $0x90] sm:$0xff] }
 0x342   : > { %2104 = vmatmul.msk.bf16.vlgmr.msra.gmra.mxu1 %vm1252_vm6, %v2103_v2 }
 0x343   : > { %v1322_v27 = vpop.f32.mrf.mxu0 }
 0x344   : > { %2105 = vmatmul.msk.bf16.vlgmr.msra.gmra.mxu2 %vm1252_vm6, %v2103_v2  ;;  %v1421_v15 = vpop.permute.xlu1 %1420  ;;  %2107 = vmatmul.msk.bf16.vlgmr.msra.gmra.mxu3 %vm1252_vm6, %v2106_v10  ;;  %v2297_v2 = vld [vmem:[#allocation8 + $0x50] sm:$0xff]  ;;  %v2324_v27 = vld [vmem:[#allocation9 + $0x28] sm:$0xff] }
 0x345   : > { %v1426_v16 = vsel %vm901_vm4, %v1421_v15, %v1423_v11  ;;  %1775 = vmatpush.bf16.msrb.mxu3 %v2294_v17  ;;  %1814 = vmatpush.bf16.msra.mxu2 %v2318_v36  ;;  %v2290_v11 = vld [vmem:[#allocation8 + $0x18] sm:$0xff]  ;;  %v2288_v15 = vld [vmem:[#allocation8 + $0x8] sm:$0xff] }
 0x346   : > { %v1432_v19 = vsel %vm1256_vm5, %v1426_v16, 0  ;;  %v1378_v20 = vpop.permute.xlu0 %1377  ;;  %v2296_v16 = vld [vmem:[#allocation8 + $0x48] sm:$0xff] }
 0x347   : > { %v1380_v21 = vsel %vm807_vm3, %v1376_v14, %v1378_v20  ;;  %1444 = vmatpush.bf16.msrb.mxu1 %v1432_v19  ;;  %v2314_v14 = vld [vmem:[#allocation8 + $0xd8] sm:$0xff]  ;;  %v2304_v19 = vld [vmem:[#allocation8 + $0x88] sm:$0xff] }
 0x348   : > { %v1388_v22 = vsel %vm1256_vm5, %v1380_v21, 0  ;;  %v2312_v20 = vld [vmem:[#allocation8 + $0xc8] sm:$0xff]  ;;  %v2287_v21 = vld [vmem:[#allocation8] sm:$0xff] }
 0x349   : > { %1410 = vmatpush.bf16.msrb.mxu0 %v1388_v22  ;;  %v1309_v26 = vpop.f32.mrf.mxu3  ;;  %1776 = vmatpush.bf16.msrb.mxu3 %v2293_v37  ;;  %v2295_v22 = vld [vmem:[#allocation8 + $0x40] sm:$0xff] }
 0x34a   : > { %1815 = vmatpush.bf16.msra.mxu2 %v2317_v30  ;;  %v2325_v26 = vld [vmem:[#allocation9 + $0x30] sm:$0xff] }
 0x34b   : > { %1801 = vmatpush.bf16.msra.mxu1 %v2310_v35 }
 0x34c   : > { %2108 = vmatmul.msk.bf16.vlgmr.msrb.gmra.mxu0 %vm1252_vm6, %v2106_v10  ;;  %v2313_v10 = vld [vmem:[#allocation8 + $0xd0] sm:$0xff] }
 0x34d   : > { %1788 = vmatpush.bf16.msra.mxu0 %v2302_v18  ;;  %1777 = vmatpush.bf16.msrb.mxu3 %v2292_v63 }
 0x34e   : > { %1816 = vmatpush.bf16.msra.mxu2 %v2316_v4 }
 0x34f   : > { %1802 = vmatpush.bf16.msra.mxu1 %v2309_v29 }
 0x351   : > { %1789 = vmatpush.bf16.msra.mxu0 %v2301_v38  ;;  %1778 = vmatpush.bf16.msrb.mxu3 %v2291_v5 }
 0x352   : > { %2110 = vmatmul.msk.bf16.vlgmr.msrb.gmra.mxu1 %vm1252_vm6, %v2109_v23  ;;  %1817 = vmatpush.bf16.msra.mxu2 %v2315_v8 }
 0x353   : > { %1803 = vmatpush.bf16.msra.mxu1 %v2308_v3 }
 0x354   : > { %2111 = vmatmul.msk.bf16.vlgmr.msrb.gmra.mxu2 %vm1252_vm6, %v2109_v23  ;;  %v2303_v23 = vld [vmem:[#allocation8 + $0x80] sm:$0xff] }
 0x355   : > { %1790 = vmatpush.bf16.msra.mxu0 %v2300_v0  ;;  %1779 = vmatpush.bf16.msrb.mxu3 %v2290_v11 }
 0x356   : > { %1818 = vmatpush.bf16.msra.mxu2 %v2314_v14 }
 0x357   : > { %1804 = vmatpush.bf16.msra.mxu1 %v2307_v7 }
 0x359   : > { %1791 = vmatpush.bf16.msra.mxu0 %v2299_v6  ;;  %1780 = vmatpush.bf16.msrb.mxu3 %v2289_v1 }
 0x35a   : > { %1819 = vmatpush.bf16.msra.mxu2 %v2313_v10 }
 0x35b   : > { %1805 = vmatpush.bf16.msra.mxu1 %v2306_v13 }
 0x35d   : > { %1792 = vmatpush.bf16.msra.mxu0 %v2298_v12  ;;  %1781 = vmatpush.bf16.msrb.mxu3 %v2288_v15 }
 0x35e   : > { %1820 = vmatpush.bf16.msra.mxu2 %v2312_v20 }
 0x35f   : > { %1806 = vmatpush.bf16.msra.mxu1 %v2305_v9 }
 0x361   : > { %1793 = vmatpush.bf16.msra.mxu0 %v2297_v2  ;;  %1782 = vmatpush.bf16.msrb.mxu3 %v2287_v21 }
 0x363   : > { %1807 = vmatpush.bf16.msra.mxu1 %v2304_v19 }
 0x365   : > { %1794 = vmatpush.bf16.msra.mxu0 %v2296_v16 }
 0x367   : > { %1808 = vmatpush.bf16.msra.mxu1 %v2303_v23 }
 0x369   : > { %1795 = vmatpush.bf16.msra.mxu0 %v2295_v22 }
 0x3af   : > { %v1272_v28 = vpop.f32.mrf.mxu1 }
 0x3b0   : > { %v1308_v43 = vadd.f32 %v1307_v24, %v1272_v28  ;;  %v2311_v24 = vld [vmem:[#allocation8 + $0xc0] sm:$0xff]  ;;  %v1499_v28 = vlaneseq }
 0x3b1   : > { %1821 = vmatpush.bf16.msra.mxu2 %v2311_v24 }
 0x3b2   : > { %vm1501_vm7 = vcmp.lt.s32.totalorder %v1499_v28, 512 }
 0x3b7   : > { %v1274_v31 = vpop.f32.mrf.mxu1  ;;  %v1285_v32 = vpop.f32.mrf.mxu2 }
 0x3b8   : > { %v1321_v48 = vadd.f32 %v1320_v25, %v1285_v32  ;;  %v2326_v25 = vld [vmem:[#allocation9 + $0x38] sm:$0xff] }
 0x3b9   : > { %1894 = vmatpush.bf16.msra.mxu3 %v2326_v25 }
 0x3bd   : > { %1895 = vmatpush.bf16.msra.mxu3 %v2325_v26 }
 0x3bf   : > { %v1287_v33 = vpop.f32.mrf.mxu2  ;;  %v1352_v34 = vpop.f32.mrf.mxu1 }
 0x3c0   : > { %v1369_v44 = vadd.f32 %v1352_v34, %v1308_v43  ;;  %v2320_v43 = vld [vmem:[#allocation9 + $0x8] sm:$0xff] }
 0x3c1   : > { %1896 = vmatpush.bf16.msra.mxu3 %v2324_v27 }
 0x3c7   : > { %v1354_v39 = vpop.f32.mrf.mxu1  ;;  %v1365_v40 = vpop.f32.mrf.mxu2 }
 0x3c8   : > { %v1399_v41 = vpop.f32.mrf.mxu3  ;;  %v1370_v53 = vadd.f32 %v1365_v40, %v1321_v48  ;;  %v2323_v40 = vld [vmem:[#allocation9 + $0x20] sm:$0xff] }
 0x3c9   : > { %v1412_v42 = vpop.f32.mrf.mxu0  ;;  %v1416_v45 = vadd.f32 %v1399_v41, %v1369_v44  ;;  %1897 = vmatpush.bf16.msra.mxu3 %v2323_v40  ;;  %v2322_v41 = vld [vmem:[#allocation9 + $0x18] sm:$0xff]  ;;  %v2319_v44 = vld [vmem:[#allocation9] sm:$0xff] }
 0x3ca   : > { %v1417_v56 = vadd.f32 %v1412_v42, %v1370_v53  ;;  %v2321_v42 = vld [vmem:[#allocation9 + $0x10] sm:$0xff] }
 0x3cd   : > { %1898 = vmatpush.bf16.msra.mxu3 %v2322_v41 }
 0x3cf   : > { %v1367_v46 = vpop.f32.mrf.mxu2  ;;  %v1446_v47 = vpop.f32.mrf.mxu1 }
 0x3d0   : > { %v1463_v49 = vadd.f32 %v1446_v47, %v1416_v45  ;;  %v1401_v50 = vpop.f32.mrf.mxu3  ;;  %v1582_v47 = vld [vmem:[%s3049_s10] sm:$0x1] }
 0x3d1   : > { %v1414_v52 = vpop.f32.mrf.mxu0  ;;  %1899 = vmatpush.bf16.msra.mxu3 %v2321_v42 }
 0x3d2   : > { %v2989_v54 = vadd.f32 %v1469_v51, %v1463_v49 }
 0x3d4   : > { %v1473_v55 = vmax.f32 %v2989_v54, 0.0 }
 0x3d5   : > { %1900 = vmatpush.bf16.msra.mxu3 %v2320_v43 }
 0x3d6   : > { %1477 = vrot.lane.b32.xlu0 %v1473_v55, %s2622_s14 }
 0x3d7   : > { %v1459_v57 = vpop.f32.mrf.mxu2  ;;  %v1448_v58 = vpop.f32.mrf.mxu1 }
 0x3d8   : > { %v1464_v59 = vadd.f32 %v1459_v57, %v1417_v56 }
 0x3d9   : > { %1901 = vmatpush.bf16.msra.mxu3 %v2319_v44 }
 0x3da   : > { %v1472_v60 = vadd.f32 %v1469_v51, %v1464_v59 }
 0x3dc   : > { %v1474_v61 = vmax.f32 %v1472_v60, 0.0  ;;  %v1845_v60 = vld [vmem:[%s3051_s12] sm:$0x1] }
 0x3de   : > { %1479 = vrot.lane.b32.xlu1 %v1474_v61, %s2622_s14 }
 0x3df   : > { %v1461_v62 = vpop.f32.mrf.mxu2 }
 0x448   : > { %v1478_v31 = vpop.permute.xlu0 %1477 }
 0x450   : > { %v1480_v32 = vpop.permute.xlu1 %1479 }
 0x451   : > { %v1482_v33 = vsel %vm558_vm0, %v1478_v31, %v1480_v32 }
 0x452   : > { %v1484_v34 = vmax.f32 %v1473_v55, %v1482_v33 }
 0x454   : > { %1503 = vst.msk [vmem:[#allocation2] sm:$0xf] %vm1501_vm7, %v1484_v34 }
 0x45b   : > { %v1504_v17 = vld [vmem:[#allocation2] sm:$0xf] }
 0x45c   : > { %v1506_v18 = vperm.slane %v1504_v17, 0  ;;  %v1507_v35 = vperm.slane %v1504_v17, 1  ;;  %v1508_v36 = vperm.slane %v1504_v17, 2  ;;  %v1509_v37 = vperm.slane %v1504_v17, 3 }
 0x45e   : > { %v1514_v38 = vpack.c.bf16 %v1506_v18, %v1506_v18  ;;  %v1515_v29 = vpack.c.bf16 %v1507_v35, %v1507_v35  ;;  %v1516_v30 = vpack.c.bf16 %v1508_v36, %v1508_v36  ;;  %v1517_v39 = vpack.c.bf16 %v1509_v37, %v1509_v37 }
 0x460   : > { %1783 = vmatmul.bf16.vlgmr.msrb.gmra.mxu3 %v1514_v38  ;;  %1796 = vmatmul.bf16.vlgmr.msra.gmra.mxu0 %v1515_v29 }
 0x461   : > { %1809 = vmatmul.bf16.vlgmr.msra.gmra.mxu1 %v1516_v30  ;;  %1822 = vmatmul.bf16.vlgmr.msra.gmra.mxu2 %v1517_v39 }
 0x4dd   : > { %v1797_v45 = vpop.f32.mrf.mxu0 }
 0x4de   : > { %v1810_v46 = vpop.f32.mrf.mxu1 }
 0x4e3   : > { %v1784_v48 = vpop.f32.mrf.mxu3 }
 0x4e4   : > { %v1785_v49 = vadd.f32 %v1784_v48, %v1582_v47  ;;  %v1823_v50 = vpop.f32.mrf.mxu2 }
 0x4e5   : > { %v1799_v51 = vpop.f32.mrf.mxu0 }
 0x4e6   : > { %v1798_v52 = vadd.f32 %v1797_v45, %v1785_v49  ;;  %v1812_v53 = vpop.f32.mrf.mxu1 }
 0x4e8   : > { %v1811_v54 = vadd.f32 %v1810_v46, %v1798_v52 }
 0x4ea   : > { %v1824_v55 = vadd.f32 %v1823_v50, %v1811_v54 }
 0x4eb   : > { %v1786_v56 = vpop.f32.mrf.mxu3 }
 0x4ec   : > { %v1827_v57 = vmax.f32 %v1824_v55, 0.0  ;;  %v1825_v58 = vpop.f32.mrf.mxu2 }
 0x4ee   : > { %v1828_v59 = vpack.c.bf16 %v1827_v57, %v1827_v57 }
 0x4f0   : > { %1902 = vmatmul.bf16.vlgmr.msra.gmra.mxu3 %v1828_v59 }
 0x573   : > { %v1903_v61 = vpop.f32.mrf.mxu3 }
 0x574   : > { %v1904_v62 = vadd.f32 %v1903_v61, %v1845_v60 }
 0x576   : > { %1907 = vst [vmem:[%s509_s19] sm:$0x1] %v1904_v62 }
 0x577   : > { %2566 = shalt.err (!%p2563_p10)
}
 0x578   : > { %2344 = dma.vmem_to_hbm [thread:$0]  (%p2780_p7), %s1920_s25, 16, %s1922_s16, %s1909_s15  }
 0x57b   : > { %v1905_v63 = vpop.f32.mrf.mxu3 }
 0x57c PF: > { %s3077_s9 = sld [smem:[#allocation16_spill]] }
 0x57d   : > { %s3079_s21 = sld [smem:[#allocation18_spill]] }
 0x582   : > { %s1933_s20 = sand.u32 1, %s3077_s9  }
 0x583   : > { %p3080_p12 = scmp.ge.s32.totalorder %s3079_s21, 2  ;;  %s1934_s11 = scalar_lea.sflag [#allocation5], %s1933_s20 }
 0x585   : > { %p2361_p13 = pnand %p3080_p12, %p2732_p6 }
 0x587   : > { %p2362_p0 = pneg %p2361_p13 }
 0x589   : > { %2596 = dma.done.wait (%p2362_p0), %s1934_s11, 16  }
 0x58a   : > { %2598 = vsyncadd (%p2362_p0), %s1934_s11, 4294967280  ;;  %s3081_s28 = sld [smem:[#allocation20_spill]]  ;;  %s3084_s25 = smov %s2605_s26 }
 0x58b   : > { %s3082_s30 = sld [smem:[#allocation17_spill]] }
 0x58c   : > { %s3083_s27 = sld [smem:[#allocation21_spill]] }
 0x590   : > { %p28_p3 = scmp.ge.s32.totalorder %s3081_s28, 4  }
 0x591   : > { %s3085_s26 = smov %s3082_s30 }
 0x592   :  { %30 = sbr.rel (!%p28_p3) target bundleno = 11 (0xb), region = 139 }
 0x597   :  { %1939 = vsyncpa [#allocation4], 1 }
 0x598   :  { %1941 = vsyncpa [#allocation4 + $0x1], 1 }
 0x599   :  { %1942 = vsyncpa [#allocation7], 1 }
 0x59a   :  { %1943 = vsyncpa [#allocation10], 1 }
 0x59b   :  { %1944 = vsyncpa [#allocation5], 1 }
 0x59c   :  { %1946 = vsyncpa [#allocation5 + $0x1], 1 }

</bundles_post_ra>
